<compile_context>
chip_gen: v5e
topology: v5e:2x2
jax: 0.10.0
libtpu: 0.0.40
codegen_flags: <defaults>
</compile_context>

<pallas_src>
import numpy as np

import jax
import jax.numpy as jnp
from jax.experimental import pallas as pl
from jax.experimental.pallas import tpu as pltpu  # noqa: F401  (kept for TPU-specific params if needed)

# ----------------------------- hyperparameters ------------------------------
B = 2            # batch
C_IN = 3         # image channels
IMG_HW = 16      # image spatial size
C_MID = 8        # conv channels
IMG_DIM = 24     # stand-in for resnet's 1000-dim feature
S = 8            # sequence length
H = 32           # bert hidden size
NH = 2           # attention heads
DH = H // NH     # head dim
FFN = 64         # bert intermediate size
VOCAB = 48       # vocab size
LN_EPS = 1e-12   # BERT layernorm eps

LANE = 128                 # lane-dense output width
HP = IMG_HW + 2            # row-padded image height
X_LANES = IMG_HW * C_IN    # 48  : conv1 input lane width  (W * C_IN)
Y_LANES = IMG_HW * C_MID   # 128 : conv activation lane width (W * C_MID)


# ------------------------------ Pallas kernels ------------------------------
def _resnet_kernel(x_ref, m1_ref, m2_ref, m3_ref, cb_ref, fcw_ref, fcb_ref, o_ref):
    """Fused image path: 3 convs + residual + relu + GAP + fc, all in VMEM.

    Activations are 2D [B*rows, W*C]; a 3x3 SAME conv is sum over 3 vertical
    taps of (row-shifted activation) @ (banded weight matrix).  The band
    matrices fold the horizontal taps and channel contraction and keep the
    activation lane dim dense at W*C_MID = 128.
    """
    f32 = jnp.float32

    def conv(xpad, m_ref, bias_row):
        # xpad: [B*(H+2), lanes_in] f32 ; m_ref: [3, lanes_in, Y_LANES] bf16
        acc = jnp.zeros((B * IMG_HW, Y_LANES), f32)
        for di in range(3):
            rows = jnp.concatenate(
                [xpad[b * HP + di: b * HP + di + IMG_HW, :] for b in range(B)],
                axis=0)                                          # [B*H, lanes_in]
            acc = acc + jnp.dot(rows.astype(jnp.bfloat16), m_ref[di],
                                preferred_element_type=f32)
        return acc + bias_row

    def pad_rows(y):
        # [B*H, Y_LANES] -> [B*(H+2), Y_LANES]: one zero row above/below each image
        zr = jnp.zeros((1, Y_LANES), f32)
        pieces = []
        for b in range(B):
            pieces += [zr, y[b * IMG_HW:(b + 1) * IMG_HW, :], zr]
        return jnp.concatenate(pieces, axis=0)

    x2 = x_ref[...].astype(f32)
    y = jnp.maximum(conv(x2, m1_ref, cb_ref[0:1, :]), 0.0)                # conv1 + relu
    z = jnp.maximum(conv(pad_rows(y), m2_ref, cb_ref[1:2, :]), 0.0)       # conv2 + relu
    z = conv(pad_rows(z), m3_ref, cb_ref[2:3, :])                         # conv3
    y = jnp.maximum(y + z, 0.0)                                           # residual + relu

    # Global average pool fused with the fc: sum rows per image, then contract
    # the (spatial-j, channel) lane dim against the W-tiled fc weight.
    rs = jnp.concatenate(
        [jnp.sum(y[b * IMG_HW:(b + 1) * IMG_HW, :], axis=0, keepdims=True)
         for b in range(B)], axis=0) * (1.0 / (IMG_HW * IMG_HW))          # [B, 128]
    feat = jnp.dot(rs.astype(jnp.bfloat16), fcw_ref[...],
                   preferred_element_type=f32) + fcb_ref[...]             # [B, 128]
    o_ref[...] = feat.astype(o_ref.dtype)


def _bert_kernel(x_ref, ln_ref, wqkv_ref, bqkv_ref, wo_ref, bo_ref,
                 w1_ref, b1_ref, w2_ref, b2_ref, o_ref):
    """Fused BERT encoder layer (embedding LN, fused QKV, all heads of
    attention, output proj, FFN, both LayerNorms) in a single pallas_call."""
    f32 = jnp.float32

    def layernorm(x, idx):
        g = ln_ref[2 * idx:2 * idx + 1, :]
        bt = ln_ref[2 * idx + 1:2 * idx + 2, :]
        mu = jnp.mean(x, axis=-1, keepdims=True)
        var = jnp.mean((x - mu) ** 2, axis=-1, keepdims=True)
        return (x - mu) * jax.lax.rsqrt(var + LN_EPS) * g + bt

    def linear(x, w_ref, b_ref):
        return jnp.dot(x.astype(jnp.bfloat16), w_ref[...],
                       preferred_element_type=f32) + b_ref[...]

    x = layernorm(x_ref[...].astype(f32), 0)                     # embedding LN
    qkv = linear(x, wqkv_ref, bqkv_ref)                          # [B*S, 3H], one matmul

    scale = 1.0 / (DH ** 0.5)
    ctx_rows = []
    for b in range(B):                                           # all heads, no grid
        r0 = b * S
        heads = []
        for h in range(NH):
            q = qkv[r0:r0 + S, h * DH:(h + 1) * DH]
            k = qkv[r0:r0 + S, H + h * DH:H + (h + 1) * DH]
            v = qkv[r0:r0 + S, 2 * H + h * DH:2 * H + (h + 1) * DH]
            s = jax.lax.dot_general(
                q.astype(jnp.bfloat16), k.astype(jnp.bfloat16),
                (((1,), (1,)), ((), ())), preferred_element_type=f32) * scale
            s = s - jnp.max(s, axis=-1, keepdims=True)           # softmax in f32
            p = jnp.exp(s)
            p = p * pl.reciprocal(jnp.sum(p, axis=-1, keepdims=True), approx=True)
            heads.append(jnp.dot(p.astype(jnp.bfloat16), v.astype(jnp.bfloat16),
                                 preferred_element_type=f32))
        ctx_rows.append(jnp.concatenate(heads, axis=1))
    ctx = jnp.concatenate(ctx_rows, axis=0)                      # [B*S, H]

    x1 = layernorm(x + linear(ctx, wo_ref, bo_ref), 1)
    # TODO(synk): HF BERT uses erf-gelu; tanh approximation used here (close numerically).
    f = jax.nn.gelu(linear(x1, w1_ref, b1_ref), approximate=True)
    out = layernorm(x1 + linear(f, w2_ref, b2_ref), 2)

    # lane-dense output slab [B*S, 128]: hidden state lives in cols [0, H)
    o_ref[...] = jnp.concatenate(
        [out, jnp.zeros((B * S, LANE - H), f32)], axis=1).astype(o_ref.dtype)


def _classifier_kernel(img_ref, txt_ref, wi_ref, wt_ref, b_ref, o_ref):
    """logits = text @ W_txt + broadcast(img @ W_img) + b (no concat/broadcast
    intermediate in HBM).  Output is a 128-lane slab; cols >= VOCAB are zero."""
    f32 = jnp.float32
    txt = jnp.dot(txt_ref[...].astype(jnp.bfloat16), wt_ref[...],
                  preferred_element_type=f32) + b_ref[...]        # [B*S, 128]
    img = jnp.dot(img_ref[...].astype(jnp.bfloat16), wi_ref[...],
                  preferred_element_type=f32)                     # [B, 128]
    for b in range(B):
        o_ref[b * S:(b + 1) * S, :] = (txt[b * S:(b + 1) * S, :] +
                                       img[b:b + 1, :]).astype(o_ref.dtype)


# ------------------------------ wrappers / model -----------------------------
def resnet_features(kp, images_nchw):
    """Image path -> [B, 128] features (cols >= IMG_DIM are exactly zero)."""
    x = jnp.transpose(images_nchw, (0, 2, 3, 1))                  # NCHW -> NHWC
    x = x.reshape(B, IMG_HW, IMG_HW * C_IN)                       # fold (W, C) into lanes
    x = jnp.pad(x, ((0, 0), (1, 1), (0, 0)))                      # vertical SAME padding
    x = x.reshape(B * HP, IMG_HW * C_IN)                          # [36, 48]
    return pl.pallas_call(
        _resnet_kernel,
        out_shape=jax.ShapeDtypeStruct((B, LANE), jnp.float32),
    )(x, kp["band1"], kp["band2"], kp["band3"], kp["cbias"], kp["fcw"], kp["fcb"])


def bert_encoder(kp, token_ids):
    """Text path -> [B*S, 128] last_hidden_state slab (cols >= H are zero)."""
    h0 = kp["tok_emb"][token_ids] + kp["pos_emb"][None, :, :]     # gather stays in XLA glue
    return pl.pallas_call(
        _bert_kernel,
        out_shape=jax.ShapeDtypeStruct((B * S, LANE), jnp.float32),
    )(h0.reshape(B * S, H), kp["ln_pack"], kp["wqkv"], kp["bqkv"],
      kp["wo"], kp["bo"], kp["w1"], kp["b1"], kp["w2"], kp["b2"])


def resnet_bert_forward(kp, images, question):
    img_feat = resnet_features(kp, images)                        # [B, 128]
    text = bert_encoder(kp, question)                             # [B*S, 128]
    logits = pl.pallas_call(
        _classifier_kernel,
        out_shape=jax.ShapeDtypeStruct((B * S, LANE), jnp.float32),
    )(img_feat, text, kp["cls_wi"], kp["cls_wt"], kp["cls_b"])
    return logits[:, :VOCAB].reshape(B, S, VOCAB)


# ------------------------------ parameter init -------------------------------
def init_params(key):
    ks = iter(jax.random.split(key, 32))
    n = lambda shape: (0.02 * jax.random.normal(next(ks), shape)).astype(jnp.float32)
    z = lambda shape: jnp.zeros(shape, jnp.float32)
    o = lambda shape: jnp.ones(shape, jnp.float32)
    # TODO(synk): pretrained resnet50 / bert-base weights are not reproducible
    # in-script; deterministic synthetic weights with the same forward structure.
    return {
        # resnet-ish (conv weights in im2col layout [ (di*3+dj)*Cin + c, Cout ])
        "conv1_w": n((9 * C_IN, C_MID)), "conv1_b": z((C_MID,)),
        "conv2_w": n((9 * C_MID, C_MID)), "conv2_b": z((C_MID,)),
        "conv3_w": n((9 * C_MID, C_MID)), "conv3_b": z((C_MID,)),
        "img_fc_w": n((C_MID, IMG_DIM)), "img_fc_b": z((IMG_DIM,)),
        # bert-ish
        "tok_emb": n((VOCAB, H)), "pos_emb": n((S, H)),
        "ln_e_g": o((H,)), "ln_e_b": z((H,)),
        "wq": n((H, H)), "bq": z((H,)),
        "wk": n((H, H)), "bk": z((H,)),
        "wv": n((H, H)), "bv": z((H,)),
        "wo": n((H, H)), "bo": z((H,)),
        "ln1_g": o((H,)), "ln1_b": z((H,)),
        "w1": n((H, FFN)), "b1": z((FFN,)),
        "w2": n((FFN, H)), "b2": z((H,)),
        "ln2_g": o((H,)), "ln2_b": z((H,)),
        # classifier: Linear(IMG_DIM + H, VOCAB)
        "cls_w": n((IMG_DIM + H, VOCAB)), "cls_b": z((VOCAB,)),
    }


def _band_matrices(w_im2col, cin, cout, w):
    """Banded conv matrices M_di[jp*cin + c, j*cout + o] = w[di, jp-j+1, c, o]."""
    wnp = np.asarray(w_im2col, dtype=np.float32)
    mats = np.zeros((3, w * cin, w * cout), np.float32)
    for di in range(3):
        for j in range(w):
            for dj in range(3):
                jp = j + dj - 1
                if 0 <= jp < w:
                    tap = wnp[(di * 3 + dj) * cin:(di * 3 + dj + 1) * cin, :]
                    mats[di, jp * cin:(jp + 1) * cin, j * cout:(j + 1) * cout] = tap
    return mats


def pack_kernel_params(p):
    """One-time (outside jit) repack of raw params into kernel-friendly,
    lane-dense layouts; matmul weights pre-cast to bf16."""
    bf = jnp.bfloat16
    f32np = lambda a: np.asarray(a, np.float32)

    # ---- resnet path ----
    band1 = jnp.asarray(_band_matrices(p["conv1_w"], C_IN, C_MID, IMG_HW), bf)
    band2 = jnp.asarray(_band_matrices(p["conv2_w"], C_MID, C_MID, IMG_HW), bf)
    band3 = jnp.asarray(_band_matrices(p["conv3_w"], C_MID, C_MID, IMG_HW), bf)
    cbias = jnp.stack([jnp.tile(p["conv1_b"], IMG_HW),
                       jnp.tile(p["conv2_b"], IMG_HW),
                       jnp.tile(p["conv3_b"], IMG_HW)], axis=0)          # [3, 128] f32
    fcw = np.zeros((IMG_HW * C_MID, LANE), np.float32)
    fcw[:, :IMG_DIM] = np.tile(f32np(p["img_fc_w"]), (IMG_HW, 1))        # W-tiled GAP+fc weight
    fcb = np.zeros((1, LANE), np.float32)
    fcb[0, :IMG_DIM] = f32np(p["img_fc_b"])

    # ---- bert path ----
    wqkv = jnp.concatenate([p["wq"], p["wk"], p["wv"]], axis=1).astype(bf)   # [H, 3H]
    bqkv = jnp.concatenate([p["bq"], p["bk"], p["bv"]]).reshape(1, 3 * H)
    ln_pack = jnp.stack([p["ln_e_g"], p["ln_e_b"], p["ln1_g"], p["ln1_b"],
                         p["ln2_g"], p["ln2_b"]], axis=0)                    # [6, H]

    # ---- classifier (split + padded to 128-lane output) ----
    cls_wi = np.zeros((LANE, LANE), np.float32)
    cls_wi[:IMG_DIM, :VOCAB] = f32np(p["cls_w"])[:IMG_DIM]
    cls_wt = np.zeros((LANE, LANE), np.float32)
    cls_wt[:H, :VOCAB] = f32np(p["cls_w"])[IMG_DIM:]
    cls_b = np.zeros((1, LANE), np.float32)
    cls_b[0, :VOCAB] = f32np(p["cls_b"])

    return {
        "band1": band1, "band2": band2, "band3": band3, "cbias": cbias,
        "fcw": jnp.asarray(fcw, bf), "fcb": jnp.asarray(fcb),
        "tok_emb": p["tok_emb"], "pos_emb": p["pos_emb"],
        "ln_pack": ln_pack,
        "wqkv": wqkv, "bqkv": bqkv,
        "wo": p["wo"].astype(bf), "bo": p["bo"].reshape(1, H),
        "w1": p["w1"].astype(bf), "b1": p["b1"].reshape(1, FFN),
        "w2": p["w2"].astype(bf), "b2": p["b2"].reshape(1, H),
        "cls_wi": jnp.asarray(cls_wi, bf), "cls_wt": jnp.asarray(cls_wt, bf),
        "cls_b": jnp.asarray(cls_b),
    }


# ----------------------------------- main ------------------------------------
if __name__ == "__main__":
    key = jax.random.PRNGKey(0)
    kparam, kimg, kq = jax.random.split(key, 3)
    raw_params = init_params(kparam)
    kp = pack_kernel_params(raw_params)

    images = jax.random.normal(kimg, (B, C_IN, IMG_HW, IMG_HW), dtype=jnp.float32)  # NCHW
    question = jax.random.randint(kq, (B, S), 0, VOCAB, dtype=jnp.int32)

    logits = jax.jit(resnet_bert_forward)(kp, images, question)
    logits = jax.block_until_ready(logits)
    assert logits.shape == (B, S, VOCAB), logits.shape
    assert logits.dtype == jnp.float32
    print("KERNEL_OK")
</pallas_src>

<mosaic_0001>
module attributes {stable_mosaic.version = 11 : i64} {
  func.func @_resnet_kernel(%arg0: memref<36x48xf32, #tpu.memory_space<vmem>>, %arg1: memref<3x48x128xbf16, #tpu.memory_space<vmem>>, %arg2: memref<3x128x128xbf16, #tpu.memory_space<vmem>>, %arg3: memref<3x128x128xbf16, #tpu.memory_space<vmem>>, %arg4: memref<3x128xf32, #tpu.memory_space<vmem>>, %arg5: memref<128x128xbf16, #tpu.memory_space<vmem>>, %arg6: memref<1x128xf32, #tpu.memory_space<vmem>>, %arg7: memref<2x128xf32, #tpu.memory_space<vmem>>) attributes {dimension_semantics = [], scalar_prefetch = 0 : i64, scratch_operands = 0 : i64, tpu.core_type = #tpu.core_type<tc>} {
    %c0 = arith.constant 0 : index
    %c0_0 = arith.constant 0 : index
    %0 = vector.load %arg0[%c0, %c0_0] : memref<36x48xf32, #tpu.memory_space<vmem>>, vector<36x48xf32>
    %c0_1 = arith.constant 0 : index
    %c0_2 = arith.constant 0 : index
    %1 = vector.load %arg4[%c0_1, %c0_2] : memref<3x128xf32, #tpu.memory_space<vmem>>, vector<1x128xf32>
    %cst = arith.constant 0.000000e+00 : f32
    %2 = vector.broadcast %cst : f32 to vector<32x128xf32>
    %3 = vector.extract_strided_slice %0 {offsets = [0, 0], sizes = [16, 48], strides = [1, 1]} : vector<36x48xf32> to vector<16x48xf32>
    %4 = vector.extract_strided_slice %0 {offsets = [18, 0], sizes = [16, 48], strides = [1, 1]} : vector<36x48xf32> to vector<16x48xf32>
    %5 = tpu.concatenate %3, %4 in 0 : vector<16x48xf32>, vector<16x48xf32> -> vector<32x48xf32>
    %6 = arith.truncf %5 : vector<32x48xf32> to vector<32x48xbf16>
    %c0_3 = arith.constant 0 : index
    %c0_4 = arith.constant 0 : index
    %c0_5 = arith.constant 0 : index
    %7 = vector.load %arg1[%c0_3, %c0_4, %c0_5] : memref<3x48x128xbf16, #tpu.memory_space<vmem>>, vector<1x48x128xbf16>
    %8 = vector.shape_cast %7 : vector<1x48x128xbf16> to vector<48x128xbf16>
    %cst_6 = arith.constant dense<0.000000e+00> : vector<32x128xf32>
    %9 = tpu.matmul %6, %8, %cst_6 {dimension_numbers = #tpu.dot_dimension_numbers<[1], [0], [0], [1], [0, 0, 1, 1], [], []>} : vector<32x48xbf16>, vector<48x128xbf16>, vector<32x128xf32> -> vector<32x128xf32>
    %10 = arith.addf %2, %9 : vector<32x128xf32>
    %11 = vector.extract_strided_slice %0 {offsets = [1, 0], sizes = [16, 48], strides = [1, 1]} : vector<36x48xf32> to vector<16x48xf32>
    %12 = vector.extract_strided_slice %0 {offsets = [19, 0], sizes = [16, 48], strides = [1, 1]} : vector<36x48xf32> to vector<16x48xf32>
    %13 = tpu.concatenate %11, %12 in 0 : vector<16x48xf32>, vector<16x48xf32> -> vector<32x48xf32>
    %14 = arith.truncf %13 : vector<32x48xf32> to vector<32x48xbf16>
    %c1 = arith.constant 1 : index
    %c0_7 = arith.constant 0 : index
    %c0_8 = arith.constant 0 : index
    %15 = vector.load %arg1[%c1, %c0_7, %c0_8] : memref<3x48x128xbf16, #tpu.memory_space<vmem>>, vector<1x48x128xbf16>
    %16 = vector.shape_cast %15 : vector<1x48x128xbf16> to vector<48x128xbf16>
    %cst_9 = arith.constant dense<0.000000e+00> : vector<32x128xf32>
    %17 = tpu.matmul %14, %16, %cst_9 {dimension_numbers = #tpu.dot_dimension_numbers<[1], [0], [0], [1], [0, 0, 1, 1], [], []>} : vector<32x48xbf16>, vector<48x128xbf16>, vector<32x128xf32> -> vector<32x128xf32>
    %18 = arith.addf %10, %17 : vector<32x128xf32>
    %19 = vector.extract_strided_slice %0 {offsets = [2, 0], sizes = [16, 48], strides = [1, 1]} : vector<36x48xf32> to vector<16x48xf32>
    %20 = vector.extract_strided_slice %0 {offsets = [20, 0], sizes = [16, 48], strides = [1, 1]} : vector<36x48xf32> to vector<16x48xf32>
    %21 = tpu.concatenate %19, %20 in 0 : vector<16x48xf32>, vector<16x48xf32> -> vector<32x48xf32>
    %22 = arith.truncf %21 : vector<32x48xf32> to vector<32x48xbf16>
    %c2 = arith.constant 2 : index
    %c0_10 = arith.constant 0 : index
    %c0_11 = arith.constant 0 : index
    %23 = vector.load %arg1[%c2, %c0_10, %c0_11] : memref<3x48x128xbf16, #tpu.memory_space<vmem>>, vector<1x48x128xbf16>
    %24 = vector.shape_cast %23 : vector<1x48x128xbf16> to vector<48x128xbf16>
    %cst_12 = arith.constant dense<0.000000e+00> : vector<32x128xf32>
    %25 = tpu.matmul %22, %24, %cst_12 {dimension_numbers = #tpu.dot_dimension_numbers<[1], [0], [0], [1], [0, 0, 1, 1], [], []>} : vector<32x48xbf16>, vector<48x128xbf16>, vector<32x128xf32> -> vector<32x128xf32>
    %26 = arith.addf %18, %25 : vector<32x128xf32>
    %27 = vector.broadcast %1 : vector<1x128xf32> to vector<32x128xf32>
    %28 = arith.addf %26, %27 : vector<32x128xf32>
    %cst_13 = arith.constant 0.000000e+00 : f32
    %29 = vector.broadcast %cst_13 : f32 to vector<32x128xf32>
    %30 = arith.maximumf %28, %29 : vector<32x128xf32>
    %cst_14 = arith.constant 0.000000e+00 : f32
    %31 = vector.broadcast %cst_14 : f32 to vector<1x128xf32>
    %32 = vector.extract_strided_slice %30 {offsets = [0, 0], sizes = [16, 128], strides = [1, 1]} : vector<32x128xf32> to vector<16x128xf32>
    %33 = vector.extract_strided_slice %30 {offsets = [16, 0], sizes = [16, 128], strides = [1, 1]} : vector<32x128xf32> to vector<16x128xf32>
    %34 = tpu.concatenate %31, %32, %31, %31, %33, %31 in 0 : vector<1x128xf32>, vector<16x128xf32>, vector<1x128xf32>, vector<1x128xf32>, vector<16x128xf32>, vector<1x128xf32> -> vector<36x128xf32>
    %c1_15 = arith.constant 1 : index
    %c0_16 = arith.constant 0 : index
    %35 = vector.load %arg4[%c1_15, %c0_16] : memref<3x128xf32, #tpu.memory_space<vmem>>, vector<1x128xf32>
    %cst_17 = arith.constant 0.000000e+00 : f32
    %36 = vector.broadcast %cst_17 : f32 to vector<32x128xf32>
    %37 = vector.extract_strided_slice %34 {offsets = [0, 0], sizes = [16, 128], strides = [1, 1]} : vector<36x128xf32> to vector<16x128xf32>
    %38 = vector.extract_strided_slice %34 {offsets = [18, 0], sizes = [16, 128], strides = [1, 1]} : vector<36x128xf32> to vector<16x128xf32>
    %39 = tpu.concatenate %37, %38 in 0 : vector<16x128xf32>, vector<16x128xf32> -> vector<32x128xf32>
    %40 = arith.truncf %39 : vector<32x128xf32> to vector<32x128xbf16>
    %c0_18 = arith.constant 0 : index
    %c0_19 = arith.constant 0 : index
    %c0_20 = arith.constant 0 : index
    %41 = vector.load %arg2[%c0_18, %c0_19, %c0_20] : memref<3x128x128xbf16, #tpu.memory_space<vmem>>, vector<1x128x128xbf16>
    %42 = vector.shape_cast %41 : vector<1x128x128xbf16> to vector<128x128xbf16>
    %cst_21 = arith.constant dense<0.000000e+00> : vector<32x128xf32>
    %43 = tpu.matmul %40, %42, %cst_21 {dimension_numbers = #tpu.dot_dimension_numbers<[1], [0], [0], [1], [0, 0, 1, 1], [], []>} : vector<32x128xbf16>, vector<128x128xbf16>, vector<32x128xf32> -> vector<32x128xf32>
    %44 = arith.addf %36, %43 : vector<32x128xf32>
    %45 = vector.extract_strided_slice %34 {offsets = [1, 0], sizes = [16, 128], strides = [1, 1]} : vector<36x128xf32> to vector<16x128xf32>
    %46 = vector.extract_strided_slice %34 {offsets = [19, 0], sizes = [16, 128], strides = [1, 1]} : vector<36x128xf32> to vector<16x128xf32>
    %47 = tpu.concatenate %45, %46 in 0 : vector<16x128xf32>, vector<16x128xf32> -> vector<32x128xf32>
    %48 = arith.truncf %47 : vector<32x128xf32> to vector<32x128xbf16>
    %c1_22 = arith.constant 1 : index
    %c0_23 = arith.constant 0 : index
    %c0_24 = arith.constant 0 : index
    %49 = vector.load %arg2[%c1_22, %c0_23, %c0_24] : memref<3x128x128xbf16, #tpu.memory_space<vmem>>, vector<1x128x128xbf16>
    %50 = vector.shape_cast %49 : vector<1x128x128xbf16> to vector<128x128xbf16>
    %cst_25 = arith.constant dense<0.000000e+00> : vector<32x128xf32>
    %51 = tpu.matmul %48, %50, %cst_25 {dimension_numbers = #tpu.dot_dimension_numbers<[1], [0], [0], [1], [0, 0, 1, 1], [], []>} : vector<32x128xbf16>, vector<128x128xbf16>, vector<32x128xf32> -> vector<32x128xf32>
    %52 = arith.addf %44, %51 : vector<32x128xf32>
    %53 = vector.extract_strided_slice %34 {offsets = [2, 0], sizes = [16, 128], strides = [1, 1]} : vector<36x128xf32> to vector<16x128xf32>
    %54 = vector.extract_strided_slice %34 {offsets = [20, 0], sizes = [16, 128], strides = [1, 1]} : vector<36x128xf32> to vector<16x128xf32>
    %55 = tpu.concatenate %53, %54 in 0 : vector<16x128xf32>, vector<16x128xf32> -> vector<32x128xf32>
    %56 = arith.truncf %55 : vector<32x128xf32> to vector<32x128xbf16>
    %c2_26 = arith.constant 2 : index
    %c0_27 = arith.constant 0 : index
    %c0_28 = arith.constant 0 : index
    %57 = vector.load %arg2[%c2_26, %c0_27, %c0_28] : memref<3x128x128xbf16, #tpu.memory_space<vmem>>, vector<1x128x128xbf16>
    %58 = vector.shape_cast %57 : vector<1x128x128xbf16> to vector<128x128xbf16>
    %cst_29 = arith.constant dense<0.000000e+00> : vector<32x128xf32>
    %59 = tpu.matmul %56, %58, %cst_29 {dimension_numbers = #tpu.dot_dimension_numbers<[1], [0], [0], [1], [0, 0, 1, 1], [], []>} : vector<32x128xbf16>, vector<128x128xbf16>, vector<32x128xf32> -> vector<32x128xf32>
    %60 = arith.addf %52, %59 : vector<32x128xf32>
    %61 = vector.broadcast %35 : vector<1x128xf32> to vector<32x128xf32>
    %62 = arith.addf %60, %61 : vector<32x128xf32>
    %cst_30 = arith.constant 0.000000e+00 : f32
    %63 = vector.broadcast %cst_30 : f32 to vector<32x128xf32>
    %64 = arith.maximumf %62, %63 : vector<32x128xf32>
    %cst_31 = arith.constant 0.000000e+00 : f32
    %65 = vector.broadcast %cst_31 : f32 to vector<1x128xf32>
    %66 = vector.extract_strided_slice %64 {offsets = [0, 0], sizes = [16, 128], strides = [1, 1]} : vector<32x128xf32> to vector<16x128xf32>
    %67 = vector.extract_strided_slice %64 {offsets = [16, 0], sizes = [16, 128], strides = [1, 1]} : vector<32x128xf32> to vector<16x128xf32>
    %68 = tpu.concatenate %65, %66, %65, %65, %67, %65 in 0 : vector<1x128xf32>, vector<16x128xf32>, vector<1x128xf32>, vector<1x128xf32>, vector<16x128xf32>, vector<1x128xf32> -> vector<36x128xf32>
    %c2_32 = arith.constant 2 : index
    %c0_33 = arith.constant 0 : index
    %69 = vector.load %arg4[%c2_32, %c0_33] : memref<3x128xf32, #tpu.memory_space<vmem>>, vector<1x128xf32>
    %cst_34 = arith.constant 0.000000e+00 : f32
    %70 = vector.broadcast %cst_34 : f32 to vector<32x128xf32>
    %71 = vector.extract_strided_slice %68 {offsets = [0, 0], sizes = [16, 128], strides = [1, 1]} : vector<36x128xf32> to vector<16x128xf32>
    %72 = vector.extract_strided_slice %68 {offsets = [18, 0], sizes = [16, 128], strides = [1, 1]} : vector<36x128xf32> to vector<16x128xf32>
    %73 = tpu.concatenate %71, %72 in 0 : vector<16x128xf32>, vector<16x128xf32> -> vector<32x128xf32>
    %74 = arith.truncf %73 : vector<32x128xf32> to vector<32x128xbf16>
    %c0_35 = arith.constant 0 : index
    %c0_36 = arith.constant 0 : index
    %c0_37 = arith.constant 0 : index
    %75 = vector.load %arg3[%c0_35, %c0_36, %c0_37] : memref<3x128x128xbf16, #tpu.memory_space<vmem>>, vector<1x128x128xbf16>
    %76 = vector.shape_cast %75 : vector<1x128x128xbf16> to vector<128x128xbf16>
    %cst_38 = arith.constant dense<0.000000e+00> : vector<32x128xf32>
    %77 = tpu.matmul %74, %76, %cst_38 {dimension_numbers = #tpu.dot_dimension_numbers<[1], [0], [0], [1], [0, 0, 1, 1], [], []>} : vector<32x128xbf16>, vector<128x128xbf16>, vector<32x128xf32> -> vector<32x128xf32>
    %78 = arith.addf %70, %77 : vector<32x128xf32>
    %79 = vector.extract_strided_slice %68 {offsets = [1, 0], sizes = [16, 128], strides = [1, 1]} : vector<36x128xf32> to vector<16x128xf32>
    %80 = vector.extract_strided_slice %68 {offsets = [19, 0], sizes = [16, 128], strides = [1, 1]} : vector<36x128xf32> to vector<16x128xf32>
    %81 = tpu.concatenate %79, %80 in 0 : vector<16x128xf32>, vector<16x128xf32> -> vector<32x128xf32>
    %82 = arith.truncf %81 : vector<32x128xf32> to vector<32x128xbf16>
    %c1_39 = arith.constant 1 : index
    %c0_40 = arith.constant 0 : index
    %c0_41 = arith.constant 0 : index
    %83 = vector.load %arg3[%c1_39, %c0_40, %c0_41] : memref<3x128x128xbf16, #tpu.memory_space<vmem>>, vector<1x128x128xbf16>
    %84 = vector.shape_cast %83 : vector<1x128x128xbf16> to vector<128x128xbf16>
    %cst_42 = arith.constant dense<0.000000e+00> : vector<32x128xf32>
    %85 = tpu.matmul %82, %84, %cst_42 {dimension_numbers = #tpu.dot_dimension_numbers<[1], [0], [0], [1], [0, 0, 1, 1], [], []>} : vector<32x128xbf16>, vector<128x128xbf16>, vector<32x128xf32> -> vector<32x128xf32>
    %86 = arith.addf %78, %85 : vector<32x128xf32>
    %87 = vector.extract_strided_slice %68 {offsets = [2, 0], sizes = [16, 128], strides = [1, 1]} : vector<36x128xf32> to vector<16x128xf32>
    %88 = vector.extract_strided_slice %68 {offsets = [20, 0], sizes = [16, 128], strides = [1, 1]} : vector<36x128xf32> to vector<16x128xf32>
    %89 = tpu.concatenate %87, %88 in 0 : vector<16x128xf32>, vector<16x128xf32> -> vector<32x128xf32>
    %90 = arith.truncf %89 : vector<32x128xf32> to vector<32x128xbf16>
    %c2_43 = arith.constant 2 : index
    %c0_44 = arith.constant 0 : index
    %c0_45 = arith.constant 0 : index
    %91 = vector.load %arg3[%c2_43, %c0_44, %c0_45] : memref<3x128x128xbf16, #tpu.memory_space<vmem>>, vector<1x128x128xbf16>
    %92 = vector.shape_cast %91 : vector<1x128x128xbf16> to vector<128x128xbf16>
    %cst_46 = arith.constant dense<0.000000e+00> : vector<32x128xf32>
    %93 = tpu.matmul %90, %92, %cst_46 {dimension_numbers = #tpu.dot_dimension_numbers<[1], [0], [0], [1], [0, 0, 1, 1], [], []>} : vector<32x128xbf16>, vector<128x128xbf16>, vector<32x128xf32> -> vector<32x128xf32>
    %94 = arith.addf %86, %93 : vector<32x128xf32>
    %95 = vector.broadcast %69 : vector<1x128xf32> to vector<32x128xf32>
    %96 = arith.addf %94, %95 : vector<32x128xf32>
    %97 = arith.addf %30, %96 : vector<32x128xf32>
    %cst_47 = arith.constant 0.000000e+00 : f32
    %98 = vector.broadcast %cst_47 : f32 to vector<32x128xf32>
    %99 = arith.maximumf %97, %98 : vector<32x128xf32>
    %100 = vector.extract_strided_slice %99 {offsets = [0, 0], sizes = [16, 128], strides = [1, 1]} : vector<32x128xf32> to vector<16x128xf32>
    %cst_48 = arith.constant dense<0.000000e+00> : vector<128xf32>
    %101 = vector.multi_reduction <add>, %100, %cst_48 [0] : vector<16x128xf32> to vector<128xf32>
    %102 = vector.shape_cast %101 : vector<128xf32> to vector<1x128xf32>
    %103 = vector.extract_strided_slice %99 {offsets = [16, 0], sizes = [16, 128], strides = [1, 1]} : vector<32x128xf32> to vector<16x128xf32>
    %cst_49 = arith.constant dense<0.000000e+00> : vector<128xf32>
    %104 = vector.multi_reduction <add>, %103, %cst_49 [0] : vector<16x128xf32> to vector<128xf32>
    %105 = vector.shape_cast %104 : vector<128xf32> to vector<1x128xf32>
    %106 = tpu.concatenate %102, %105 in 0 : vector<1x128xf32>, vector<1x128xf32> -> vector<2x128xf32>
    %cst_50 = arith.constant 3.906250e-03 : f32
    %107 = vector.broadcast %cst_50 : f32 to vector<2x128xf32>
    %108 = arith.mulf %106, %107 : vector<2x128xf32>
    %109 = arith.truncf %108 : vector<2x128xf32> to vector<2x128xbf16>
    %c0_51 = arith.constant 0 : index
    %c0_52 = arith.constant 0 : index
    %110 = vector.load %arg5[%c0_51, %c0_52] : memref<128x128xbf16, #tpu.memory_space<vmem>>, vector<128x128xbf16>
    %cst_53 = arith.constant dense<0.000000e+00> : vector<2x128xf32>
    %111 = tpu.matmul %109, %110, %cst_53 {dimension_numbers = #tpu.dot_dimension_numbers<[1], [0], [0], [1], [0, 0, 1, 1], [], []>} : vector<2x128xbf16>, vector<128x128xbf16>, vector<2x128xf32> -> vector<2x128xf32>
    %c0_54 = arith.constant 0 : index
    %c0_55 = arith.constant 0 : index
    %112 = vector.load %arg6[%c0_54, %c0_55] : memref<1x128xf32, #tpu.memory_space<vmem>>, vector<1x128xf32>
    %113 = vector.broadcast %112 : vector<1x128xf32> to vector<2x128xf32>
    %114 = arith.addf %111, %113 : vector<2x128xf32>
    %c0_56 = arith.constant 0 : index
    %c0_57 = arith.constant 0 : index
    %115 = vector.load %arg7[%c0_56, %c0_57] : memref<2x128xf32, #tpu.memory_space<vmem>>, vector<2x128xf32>
    tpu.vector_store %arg7[%c0_56, %c0_57], %114 {strides = array<i32>} : memref<2x128xf32, #tpu.memory_space<vmem>>, vector<2x128xf32>,
    return
  }
}

module attributes {stable_mosaic.version = 11 : i64} {
  func.func @_classifier_kernel(%arg0: memref<2x128xf32, #tpu.memory_space<vmem>>, %arg1: memref<16x128xf32, #tpu.memory_space<vmem>>, %arg2: memref<128x128xbf16, #tpu.memory_space<vmem>>, %arg3: memref<128x128xbf16, #tpu.memory_space<vmem>>, %arg4: memref<1x128xf32, #tpu.memory_space<vmem>>, %arg5: memref<16x128xf32, #tpu.memory_space<vmem>>) attributes {dimension_semantics = [], scalar_prefetch = 0 : i64, scratch_operands = 0 : i64, tpu.core_type = #tpu.core_type<tc>} {
    %c0 = arith.constant 0 : index
    %c0_0 = arith.constant 0 : index
    %0 = vector.load %arg1[%c0, %c0_0] : memref<16x128xf32, #tpu.memory_space<vmem>>, vector<16x128xf32>
    %1 = arith.truncf %0 : vector<16x128xf32> to vector<16x128xbf16>
    %c0_1 = arith.constant 0 : index
    %c0_2 = arith.constant 0 : index
    %2 = vector.load %arg3[%c0_1, %c0_2] : memref<128x128xbf16, #tpu.memory_space<vmem>>, vector<128x128xbf16>
    %cst = arith.constant dense<0.000000e+00> : vector<16x128xf32>
    %3 = tpu.matmul %1, %2, %cst {dimension_numbers = #tpu.dot_dimension_numbers<[1], [0], [0], [1], [0, 0, 1, 1], [], []>} : vector<16x128xbf16>, vector<128x128xbf16>, vector<16x128xf32> -> vector<16x128xf32>
    %c0_3 = arith.constant 0 : index
    %c0_4 = arith.constant 0 : index
    %4 = vector.load %arg4[%c0_3, %c0_4] : memref<1x128xf32, #tpu.memory_space<vmem>>, vector<1x128xf32>
    %5 = vector.broadcast %4 : vector<1x128xf32> to vector<16x128xf32>
    %6 = arith.addf %3, %5 : vector<16x128xf32>
    %c0_5 = arith.constant 0 : index
    %c0_6 = arith.constant 0 : index
    %7 = vector.load %arg0[%c0_5, %c0_6] : memref<2x128xf32, #tpu.memory_space<vmem>>, vector<2x128xf32>
    %8 = arith.truncf %7 : vector<2x128xf32> to vector<2x128xbf16>
    %c0_7 = arith.constant 0 : index
    %c0_8 = arith.constant 0 : index
    %9 = vector.load %arg2[%c0_7, %c0_8] : memref<128x128xbf16, #tpu.memory_space<vmem>>, vector<128x128xbf16>
    %cst_9 = arith.constant dense<0.000000e+00> : vector<2x128xf32>
    %10 = tpu.matmul %8, %9, %cst_9 {dimension_numbers = #tpu.dot_dimension_numbers<[1], [0], [0], [1], [0, 0, 1, 1], [], []>} : vector<2x128xbf16>, vector<128x128xbf16>, vector<2x128xf32> -> vector<2x128xf32>
    %11 = vector.extract_strided_slice %6 {offsets = [0, 0], sizes = [8, 128], strides = [1, 1]} : vector<16x128xf32> to vector<8x128xf32>
    %12 = vector.extract_strided_slice %10 {offsets = [0, 0], sizes = [1, 128], strides = [1, 1]} : vector<2x128xf32> to vector<1x128xf32>
    %13 = vector.broadcast %12 : vector<1x128xf32> to vector<8x128xf32>
    %14 = arith.addf %11, %13 : vector<8x128xf32>
    %c0_10 = arith.constant 0 : index
    %c0_11 = arith.constant 0 : index
    %15 = vector.load %arg5[%c0_10, %c0_11] : memref<16x128xf32, #tpu.memory_space<vmem>>, vector<8x128xf32>
    tpu.vector_store %arg5[%c0_10, %c0_11], %14 {strides = array<i32>} : memref<16x128xf32, #tpu.memory_space<vmem>>, vector<8x128xf32>,
    %16 = vector.extract_strided_slice %6 {offsets = [8, 0], sizes = [8, 128], strides = [1, 1]} : vector<16x128xf32> to vector<8x128xf32>
    %17 = vector.extract_strided_slice %10 {offsets = [1, 0], sizes = [1, 128], strides = [1, 1]} : vector<2x128xf32> to vector<1x128xf32>
    %18 = vector.broadcast %17 : vector<1x128xf32> to vector<8x128xf32>
    %19 = arith.addf %16, %18 : vector<8x128xf32>
    %c8 = arith.constant 8 : index
    %c0_12 = arith.constant 0 : index
    %20 = vector.load %arg5[%c8, %c0_12] : memref<16x128xf32, #tpu.memory_space<vmem>>, vector<8x128xf32>
    tpu.vector_store %arg5[%c8, %c0_12], %19 {strides = array<i32>} : memref<16x128xf32, #tpu.memory_space<vmem>>, vector<8x128xf32>,
    return
  }
}

module attributes {stable_mosaic.version = 11 : i64} {
  func.func @_bert_kernel(%arg0: memref<16x32xf32, #tpu.memory_space<vmem>>, %arg1: memref<6x32xf32, #tpu.memory_space<vmem>>, %arg2: memref<32x96xbf16, #tpu.memory_space<vmem>>, %arg3: memref<1x96xf32, #tpu.memory_space<vmem>>, %arg4: memref<32x32xbf16, #tpu.memory_space<vmem>>, %arg5: memref<1x32xf32, #tpu.memory_space<vmem>>, %arg6: memref<32x64xbf16, #tpu.memory_space<vmem>>, %arg7: memref<1x64xf32, #tpu.memory_space<vmem>>, %arg8: memref<64x32xbf16, #tpu.memory_space<vmem>>, %arg9: memref<1x32xf32, #tpu.memory_space<vmem>>, %arg10: memref<16x128xf32, #tpu.memory_space<vmem>>) attributes {dimension_semantics = [], scalar_prefetch = 0 : i64, scratch_operands = 0 : i64, tpu.core_type = #tpu.core_type<tc>} {
    %c0 = arith.constant 0 : index
    %c0_0 = arith.constant 0 : index
    %0 = vector.load %arg0[%c0, %c0_0] : memref<16x32xf32, #tpu.memory_space<vmem>>, vector<16x32xf32>
    %c0_1 = arith.constant 0 : index
    %c0_2 = arith.constant 0 : index
    %1 = vector.load %arg1[%c0_1, %c0_2] : memref<6x32xf32, #tpu.memory_space<vmem>>, vector<1x32xf32>
    %c1 = arith.constant 1 : index
    %c0_3 = arith.constant 0 : index
    %2 = vector.load %arg1[%c1, %c0_3] : memref<6x32xf32, #tpu.memory_space<vmem>>, vector<1x32xf32>
    %cst = arith.constant dense<0.000000e+00> : vector<16xf32>
    %3 = vector.multi_reduction <add>, %0, %cst [1] : vector<16x32xf32> to vector<16xf32>
    %4 = vector.shape_cast %3 : vector<16xf32> to vector<16x1xf32>
    %cst_4 = arith.constant 3.200000e+01 : f32
    %5 = vector.broadcast %cst_4 : f32 to vector<16x1xf32>
    %6 = arith.divf %4, %5 : vector<16x1xf32>
    %7 = vector.broadcast %6 : vector<16x1xf32> to vector<16x32xf32>
    %8 = arith.subf %0, %7 : vector<16x32xf32>
    %9 = arith.mulf %8, %8 : vector<16x32xf32>
    %cst_5 = arith.constant dense<0.000000e+00> : vector<16xf32>
    %10 = vector.multi_reduction <add>, %9, %cst_5 [1] : vector<16x32xf32> to vector<16xf32>
    %11 = vector.shape_cast %10 : vector<16xf32> to vector<16x1xf32>
    %cst_6 = arith.constant 3.200000e+01 : f32
    %12 = vector.broadcast %cst_6 : f32 to vector<16x1xf32>
    %13 = arith.divf %11, %12 : vector<16x1xf32>
    %14 = vector.broadcast %6 : vector<16x1xf32> to vector<16x32xf32>
    %15 = arith.subf %0, %14 : vector<16x32xf32>
    %cst_7 = arith.constant 9.99999996E-13 : f32
    %16 = vector.broadcast %cst_7 : f32 to vector<16x1xf32>
    %17 = arith.addf %13, %16 : vector<16x1xf32>
    %18 = math.rsqrt %17 : vector<16x1xf32>
    %19 = vector.broadcast %18 : vector<16x1xf32> to vector<16x32xf32>
    %20 = arith.mulf %15, %19 : vector<16x32xf32>
    %21 = vector.broadcast %1 : vector<1x32xf32> to vector<16x32xf32>
    %22 = arith.mulf %20, %21 : vector<16x32xf32>
    %23 = vector.broadcast %2 : vector<1x32xf32> to vector<16x32xf32>
    %24 = arith.addf %22, %23 : vector<16x32xf32>
    %25 = arith.truncf %24 : vector<16x32xf32> to vector<16x32xbf16>
    %c0_8 = arith.constant 0 : index
    %c0_9 = arith.constant 0 : index
    %26 = vector.load %arg2[%c0_8, %c0_9] : memref<32x96xbf16, #tpu.memory_space<vmem>>, vector<32x96xbf16>
    %cst_10 = arith.constant dense<0.000000e+00> : vector<16x96xf32>
    %27 = tpu.matmul %25, %26, %cst_10 {dimension_numbers = #tpu.dot_dimension_numbers<[1], [0], [0], [1], [0, 0, 1, 1], [], []>} : vector<16x32xbf16>, vector<32x96xbf16>, vector<16x96xf32> -> vector<16x96xf32>
    %c0_11 = arith.constant 0 : index
    %c0_12 = arith.constant 0 : index
    %28 = vector.load %arg3[%c0_11, %c0_12] : memref<1x96xf32, #tpu.memory_space<vmem>>, vector<1x96xf32>
    %29 = vector.broadcast %28 : vector<1x96xf32> to vector<16x96xf32>
    %30 = arith.addf %27, %29 : vector<16x96xf32>
    %31 = vector.extract_strided_slice %30 {offsets = [0, 0], sizes = [8, 16], strides = [1, 1]} : vector<16x96xf32> to vector<8x16xf32>
    %32 = vector.extract_strided_slice %30 {offsets = [0, 32], sizes = [8, 16], strides = [1, 1]} : vector<16x96xf32> to vector<8x16xf32>
    %33 = vector.extract_strided_slice %30 {offsets = [0, 64], sizes = [8, 16], strides = [1, 1]} : vector<16x96xf32> to vector<8x16xf32>
    %34 = arith.truncf %31 : vector<8x16xf32> to vector<8x16xbf16>
    %35 = arith.truncf %32 : vector<8x16xf32> to vector<8x16xbf16>
    %cst_13 = arith.constant dense<0.000000e+00> : vector<8x8xf32>
    %36 = tpu.matmul %34, %35, %cst_13 {dimension_numbers = #tpu.dot_dimension_numbers<[1], [1], [0], [0], [0, 0, 1, 0], [], []>} : vector<8x16xbf16>, vector<8x16xbf16>, vector<8x8xf32> -> vector<8x8xf32>
    %cst_14 = arith.constant 2.500000e-01 : f32
    %37 = vector.broadcast %cst_14 : f32 to vector<8x8xf32>
    %38 = arith.mulf %36, %37 : vector<8x8xf32>
    %cst_15 = arith.constant dense<0xFF800000> : vector<8xf32>
    %39 = vector.multi_reduction <maximumf>, %38, %cst_15 [1] : vector<8x8xf32> to vector<8xf32>
    %40 = vector.shape_cast %39 : vector<8xf32> to vector<8x1xf32>
    %41 = vector.broadcast %40 : vector<8x1xf32> to vector<8x8xf32>
    %42 = arith.subf %38, %41 : vector<8x8xf32>
    %43 = math.exp %42 : vector<8x8xf32>
    %cst_16 = arith.constant dense<0.000000e+00> : vector<8xf32>
    %44 = vector.multi_reduction <add>, %43, %cst_16 [1] : vector<8x8xf32> to vector<8xf32>
    %45 = vector.shape_cast %44 : vector<8xf32> to vector<8x1xf32>
    %46 = tpu.reciprocal %45 {approx = true} : vector<8x1xf32> -> vector<8x1xf32>
    %47 = vector.broadcast %46 : vector<8x1xf32> to vector<8x8xf32>
    %48 = arith.mulf %43, %47 : vector<8x8xf32>
    %49 = arith.truncf %48 : vector<8x8xf32> to vector<8x8xbf16>
    %50 = arith.truncf %33 : vector<8x16xf32> to vector<8x16xbf16>
    %cst_17 = arith.constant dense<0.000000e+00> : vector<8x16xf32>
    %51 = tpu.matmul %49, %50, %cst_17 {dimension_numbers = #tpu.dot_dimension_numbers<[1], [0], [0], [1], [0, 0, 1, 1], [], []>} : vector<8x8xbf16>, vector<8x16xbf16>, vector<8x16xf32> -> vector<8x16xf32>
    %52 = vector.extract_strided_slice %30 {offsets = [0, 16], sizes = [8, 16], strides = [1, 1]} : vector<16x96xf32> to vector<8x16xf32>
    %53 = vector.extract_strided_slice %30 {offsets = [0, 48], sizes = [8, 16], strides = [1, 1]} : vector<16x96xf32> to vector<8x16xf32>
    %54 = vector.extract_strided_slice %30 {offsets = [0, 80], sizes = [8, 16], strides = [1, 1]} : vector<16x96xf32> to vector<8x16xf32>
    %55 = arith.truncf %52 : vector<8x16xf32> to vector<8x16xbf16>
    %56 = arith.truncf %53 : vector<8x16xf32> to vector<8x16xbf16>
    %cst_18 = arith.constant dense<0.000000e+00> : vector<8x8xf32>
    %57 = tpu.matmul %55, %56, %cst_18 {dimension_numbers = #tpu.dot_dimension_numbers<[1], [1], [0], [0], [0, 0, 1, 0], [], []>} : vector<8x16xbf16>, vector<8x16xbf16>, vector<8x8xf32> -> vector<8x8xf32>
    %cst_19 = arith.constant 2.500000e-01 : f32
    %58 = vector.broadcast %cst_19 : f32 to vector<8x8xf32>
    %59 = arith.mulf %57, %58 : vector<8x8xf32>
    %cst_20 = arith.constant dense<0xFF800000> : vector<8xf32>
    %60 = vector.multi_reduction <maximumf>, %59, %cst_20 [1] : vector<8x8xf32> to vector<8xf32>
    %61 = vector.shape_cast %60 : vector<8xf32> to vector<8x1xf32>
    %62 = vector.broadcast %61 : vector<8x1xf32> to vector<8x8xf32>
    %63 = arith.subf %59, %62 : vector<8x8xf32>
    %64 = math.exp %63 : vector<8x8xf32>
    %cst_21 = arith.constant dense<0.000000e+00> : vector<8xf32>
    %65 = vector.multi_reduction <add>, %64, %cst_21 [1] : vector<8x8xf32> to vector<8xf32>
    %66 = vector.shape_cast %65 : vector<8xf32> to vector<8x1xf32>
    %67 = tpu.reciprocal %66 {approx = true} : vector<8x1xf32> -> vector<8x1xf32>
    %68 = vector.broadcast %67 : vector<8x1xf32> to vector<8x8xf32>
    %69 = arith.mulf %64, %68 : vector<8x8xf32>
    %70 = arith.truncf %69 : vector<8x8xf32> to vector<8x8xbf16>
    %71 = arith.truncf %54 : vector<8x16xf32> to vector<8x16xbf16>
    %cst_22 = arith.constant dense<0.000000e+00> : vector<8x16xf32>
    %72 = tpu.matmul %70, %71, %cst_22 {dimension_numbers = #tpu.dot_dimension_numbers<[1], [0], [0], [1], [0, 0, 1, 1], [], []>} : vector<8x8xbf16>, vector<8x16xbf16>, vector<8x16xf32> -> vector<8x16xf32>
    %73 = tpu.concatenate %51, %72 in 1 : vector<8x16xf32>, vector<8x16xf32> -> vector<8x32xf32>
    %74 = vector.extract_strided_slice %30 {offsets = [8, 0], sizes = [8, 16], strides = [1, 1]} : vector<16x96xf32> to vector<8x16xf32>
    %75 = vector.extract_strided_slice %30 {offsets = [8, 32], sizes = [8, 16], strides = [1, 1]} : vector<16x96xf32> to vector<8x16xf32>
    %76 = vector.extract_strided_slice %30 {offsets = [8, 64], sizes = [8, 16], strides = [1, 1]} : vector<16x96xf32> to vector<8x16xf32>
    %77 = arith.truncf %74 : vector<8x16xf32> to vector<8x16xbf16>
    %78 = arith.truncf %75 : vector<8x16xf32> to vector<8x16xbf16>
    %cst_23 = arith.constant dense<0.000000e+00> : vector<8x8xf32>
    %79 = tpu.matmul %77, %78, %cst_23 {dimension_numbers = #tpu.dot_dimension_numbers<[1], [1], [0], [0], [0, 0, 1, 0], [], []>} : vector<8x16xbf16>, vector<8x16xbf16>, vector<8x8xf32> -> vector<8x8xf32>
    %cst_24 = arith.constant 2.500000e-01 : f32
    %80 = vector.broadcast %cst_24 : f32 to vector<8x8xf32>
    %81 = arith.mulf %79, %80 : vector<8x8xf32>
    %cst_25 = arith.constant dense<0xFF800000> : vector<8xf32>
    %82 = vector.multi_reduction <maximumf>, %81, %cst_25 [1] : vector<8x8xf32> to vector<8xf32>
    %83 = vector.shape_cast %82 : vector<8xf32> to vector<8x1xf32>
    %84 = vector.broadcast %83 : vector<8x1xf32> to vector<8x8xf32>
    %85 = arith.subf %81, %84 : vector<8x8xf32>
    %86 = math.exp %85 : vector<8x8xf32>
    %cst_26 = arith.constant dense<0.000000e+00> : vector<8xf32>
    %87 = vector.multi_reduction <add>, %86, %cst_26 [1] : vector<8x8xf32> to vector<8xf32>
    %88 = vector.shape_cast %87 : vector<8xf32> to vector<8x1xf32>
    %89 = tpu.reciprocal %88 {approx = true} : vector<8x1xf32> -> vector<8x1xf32>
    %90 = vector.broadcast %89 : vector<8x1xf32> to vector<8x8xf32>
    %91 = arith.mulf %86, %90 : vector<8x8xf32>
    %92 = arith.truncf %91 : vector<8x8xf32> to vector<8x8xbf16>
    %93 = arith.truncf %76 : vector<8x16xf32> to vector<8x16xbf16>
    %cst_27 = arith.constant dense<0.000000e+00> : vector<8x16xf32>
    %94 = tpu.matmul %92, %93, %cst_27 {dimension_numbers = #tpu.dot_dimension_numbers<[1], [0], [0], [1], [0, 0, 1, 1], [], []>} : vector<8x8xbf16>, vector<8x16xbf16>, vector<8x16xf32> -> vector<8x16xf32>
    %95 = vector.extract_strided_slice %30 {offsets = [8, 16], sizes = [8, 16], strides = [1, 1]} : vector<16x96xf32> to vector<8x16xf32>
    %96 = vector.extract_strided_slice %30 {offsets = [8, 48], sizes = [8, 16], strides = [1, 1]} : vector<16x96xf32> to vector<8x16xf32>
    %97 = vector.extract_strided_slice %30 {offsets = [8, 80], sizes = [8, 16], strides = [1, 1]} : vector<16x96xf32> to vector<8x16xf32>
    %98 = arith.truncf %95 : vector<8x16xf32> to vector<8x16xbf16>
    %99 = arith.truncf %96 : vector<8x16xf32> to vector<8x16xbf16>
    %cst_28 = arith.constant dense<0.000000e+00> : vector<8x8xf32>
    %100 = tpu.matmul %98, %99, %cst_28 {dimension_numbers = #tpu.dot_dimension_numbers<[1], [1], [0], [0], [0, 0, 1, 0], [], []>} : vector<8x16xbf16>, vector<8x16xbf16>, vector<8x8xf32> -> vector<8x8xf32>
    %cst_29 = arith.constant 2.500000e-01 : f32
    %101 = vector.broadcast %cst_29 : f32 to vector<8x8xf32>
    %102 = arith.mulf %100, %101 : vector<8x8xf32>
    %cst_30 = arith.constant dense<0xFF800000> : vector<8xf32>
    %103 = vector.multi_reduction <maximumf>, %102, %cst_30 [1] : vector<8x8xf32> to vector<8xf32>
    %104 = vector.shape_cast %103 : vector<8xf32> to vector<8x1xf32>
    %105 = vector.broadcast %104 : vector<8x1xf32> to vector<8x8xf32>
    %106 = arith.subf %102, %105 : vector<8x8xf32>
    %107 = math.exp %106 : vector<8x8xf32>
    %cst_31 = arith.constant dense<0.000000e+00> : vector<8xf32>
    %108 = vector.multi_reduction <add>, %107, %cst_31 [1] : vector<8x8xf32> to vector<8xf32>
    %109 = vector.shape_cast %108 : vector<8xf32> to vector<8x1xf32>
    %110 = tpu.reciprocal %109 {approx = true} : vector<8x1xf32> -> vector<8x1xf32>
    %111 = vector.broadcast %110 : vector<8x1xf32> to vector<8x8xf32>
    %112 = arith.mulf %107, %111 : vector<8x8xf32>
    %113 = arith.truncf %112 : vector<8x8xf32> to vector<8x8xbf16>
    %114 = arith.truncf %97 : vector<8x16xf32> to vector<8x16xbf16>
    %cst_32 = arith.constant dense<0.000000e+00> : vector<8x16xf32>
    %115 = tpu.matmul %113, %114, %cst_32 {dimension_numbers = #tpu.dot_dimension_numbers<[1], [0], [0], [1], [0, 0, 1, 1], [], []>} : vector<8x8xbf16>, vector<8x16xbf16>, vector<8x16xf32> -> vector<8x16xf32>
    %116 = tpu.concatenate %94, %115 in 1 : vector<8x16xf32>, vector<8x16xf32> -> vector<8x32xf32>
    %117 = tpu.concatenate %73, %116 in 0 : vector<8x32xf32>, vector<8x32xf32> -> vector<16x32xf32>
    %118 = arith.truncf %117 : vector<16x32xf32> to vector<16x32xbf16>
    %c0_33 = arith.constant 0 : index
    %c0_34 = arith.constant 0 : index
    %119 = vector.load %arg4[%c0_33, %c0_34] : memref<32x32xbf16, #tpu.memory_space<vmem>>, vector<32x32xbf16>
    %cst_35 = arith.constant dense<0.000000e+00> : vector<16x32xf32>
    %120 = tpu.matmul %118, %119, %cst_35 {dimension_numbers = #tpu.dot_dimension_numbers<[1], [0], [0], [1], [0, 0, 1, 1], [], []>} : vector<16x32xbf16>, vector<32x32xbf16>, vector<16x32xf32> -> vector<16x32xf32>
    %c0_36 = arith.constant 0 : index
    %c0_37 = arith.constant 0 : index
    %121 = vector.load %arg5[%c0_36, %c0_37] : memref<1x32xf32, #tpu.memory_space<vmem>>, vector<1x32xf32>
    %122 = vector.broadcast %121 : vector<1x32xf32> to vector<16x32xf32>
    %123 = arith.addf %120, %122 : vector<16x32xf32>
    %124 = arith.addf %24, %123 : vector<16x32xf32>
    %c2 = arith.constant 2 : index
    %c0_38 = arith.constant 0 : index
    %125 = vector.load %arg1[%c2, %c0_38] : memref<6x32xf32, #tpu.memory_space<vmem>>, vector<1x32xf32>
    %c3 = arith.constant 3 : index
    %c0_39 = arith.constant 0 : index
    %126 = vector.load %arg1[%c3, %c0_39] : memref<6x32xf32, #tpu.memory_space<vmem>>, vector<1x32xf32>
    %cst_40 = arith.constant dense<0.000000e+00> : vector<16xf32>
    %127 = vector.multi_reduction <add>, %124, %cst_40 [1] : vector<16x32xf32> to vector<16xf32>
    %128 = vector.shape_cast %127 : vector<16xf32> to vector<16x1xf32>
    %cst_41 = arith.constant 3.200000e+01 : f32
    %129 = vector.broadcast %cst_41 : f32 to vector<16x1xf32>
    %130 = arith.divf %128, %129 : vector<16x1xf32>
    %131 = vector.broadcast %130 : vector<16x1xf32> to vector<16x32xf32>
    %132 = arith.subf %124, %131 : vector<16x32xf32>
    %133 = arith.mulf %132, %132 : vector<16x32xf32>
    %cst_42 = arith.constant dense<0.000000e+00> : vector<16xf32>
    %134 = vector.multi_reduction <add>, %133, %cst_42 [1] : vector<16x32xf32> to vector<16xf32>
    %135 = vector.shape_cast %134 : vector<16xf32> to vector<16x1xf32>
    %cst_43 = arith.constant 3.200000e+01 : f32
    %136 = vector.broadcast %cst_43 : f32 to vector<16x1xf32>
    %137 = arith.divf %135, %136 : vector<16x1xf32>
    %138 = vector.broadcast %130 : vector<16x1xf32> to vector<16x32xf32>
    %139 = arith.subf %124, %138 : vector<16x32xf32>
    %cst_44 = arith.constant 9.99999996E-13 : f32
    %140 = vector.broadcast %cst_44 : f32 to vector<16x1xf32>
    %141 = arith.addf %137, %140 : vector<16x1xf32>
    %142 = math.rsqrt %141 : vector<16x1xf32>
    %143 = vector.broadcast %142 : vector<16x1xf32> to vector<16x32xf32>
    %144 = arith.mulf %139, %143 : vector<16x32xf32>
    %145 = vector.broadcast %125 : vector<1x32xf32> to vector<16x32xf32>
    %146 = arith.mulf %144, %145 : vector<16x32xf32>
    %147 = vector.broadcast %126 : vector<1x32xf32> to vector<16x32xf32>
    %148 = arith.addf %146, %147 : vector<16x32xf32>
    %149 = arith.truncf %148 : vector<16x32xf32> to vector<16x32xbf16>
    %c0_45 = arith.constant 0 : index
    %c0_46 = arith.constant 0 : index
    %150 = vector.load %arg6[%c0_45, %c0_46] : memref<32x64xbf16, #tpu.memory_space<vmem>>, vector<32x64xbf16>
    %cst_47 = arith.constant dense<0.000000e+00> : vector<16x64xf32>
    %151 = tpu.matmul %149, %150, %cst_47 {dimension_numbers = #tpu.dot_dimension_numbers<[1], [0], [0], [1], [0, 0, 1, 1], [], []>} : vector<16x32xbf16>, vector<32x64xbf16>, vector<16x64xf32> -> vector<16x64xf32>
    %c0_48 = arith.constant 0 : index
    %c0_49 = arith.constant 0 : index
    %152 = vector.load %arg7[%c0_48, %c0_49] : memref<1x64xf32, #tpu.memory_space<vmem>>, vector<1x64xf32>
    %153 = vector.broadcast %152 : vector<1x64xf32> to vector<16x64xf32>
    %154 = arith.addf %151, %153 : vector<16x64xf32>
    %155 = arith.mulf %154, %154 : vector<16x64xf32>
    %156 = arith.mulf %154, %155 : vector<16x64xf32>
    %cst_50 = arith.constant 4.471500e-02 : f32
    %157 = vector.broadcast %cst_50 : f32 to vector<16x64xf32>
    %158 = arith.mulf %157, %156 : vector<16x64xf32>
    %159 = arith.addf %154, %158 : vector<16x64xf32>
    %cst_51 = arith.constant 0.797884583 : f32
    %160 = vector.broadcast %cst_51 : f32 to vector<16x64xf32>
    %161 = arith.mulf %160, %159 : vector<16x64xf32>
    %162 = math.tanh %161 : vector<16x64xf32>
    %cst_52 = arith.constant 1.000000e+00 : f32
    %163 = vector.broadcast %cst_52 : f32 to vector<16x64xf32>
    %164 = arith.addf %163, %162 : vector<16x64xf32>
    %cst_53 = arith.constant 5.000000e-01 : f32
    %165 = vector.broadcast %cst_53 : f32 to vector<16x64xf32>
    %166 = arith.mulf %165, %164 : vector<16x64xf32>
    %167 = arith.mulf %154, %166 : vector<16x64xf32>
    %168 = arith.truncf %167 : vector<16x64xf32> to vector<16x64xbf16>
    %c0_54 = arith.constant 0 : index
    %c0_55 = arith.constant 0 : index
    %169 = vector.load %arg8[%c0_54, %c0_55] : memref<64x32xbf16, #tpu.memory_space<vmem>>, vector<64x32xbf16>
    %cst_56 = arith.constant dense<0.000000e+00> : vector<16x32xf32>
    %170 = tpu.matmul %168, %169, %cst_56 {dimension_numbers = #tpu.dot_dimension_numbers<[1], [0], [0], [1], [0, 0, 1, 1], [], []>} : vector<16x64xbf16>, vector<64x32xbf16>, vector<16x32xf32> -> vector<16x32xf32>
    %c0_57 = arith.constant 0 : index
    %c0_58 = arith.constant 0 : index
    %171 = vector.load %arg9[%c0_57, %c0_58] : memref<1x32xf32, #tpu.memory_space<vmem>>, vector<1x32xf32>
    %172 = vector.broadcast %171 : vector<1x32xf32> to vector<16x32xf32>
    %173 = arith.addf %170, %172 : vector<16x32xf32>
    %174 = arith.addf %148, %173 : vector<16x32xf32>
    %c4 = arith.constant 4 : index
    %c0_59 = arith.constant 0 : index
    %175 = vector.load %arg1[%c4, %c0_59] : memref<6x32xf32, #tpu.memory_space<vmem>>, vector<1x32xf32>
    %c5 = arith.constant 5 : index
    %c0_60 = arith.constant 0 : index
    %176 = vector.load %arg1[%c5, %c0_60] : memref<6x32xf32, #tpu.memory_space<vmem>>, vector<1x32xf32>
    %cst_61 = arith.constant dense<0.000000e+00> : vector<16xf32>
    %177 = vector.multi_reduction <add>, %174, %cst_61 [1] : vector<16x32xf32> to vector<16xf32>
    %178 = vector.shape_cast %177 : vector<16xf32> to vector<16x1xf32>
    %cst_62 = arith.constant 3.200000e+01 : f32
    %179 = vector.broadcast %cst_62 : f32 to vector<16x1xf32>
    %180 = arith.divf %178, %179 : vector<16x1xf32>
    %181 = vector.broadcast %180 : vector<16x1xf32> to vector<16x32xf32>
    %182 = arith.subf %174, %181 : vector<16x32xf32>
    %183 = arith.mulf %182, %182 : vector<16x32xf32>
    %cst_63 = arith.constant dense<0.000000e+00> : vector<16xf32>
    %184 = vector.multi_reduction <add>, %183, %cst_63 [1] : vector<16x32xf32> to vector<16xf32>
    %185 = vector.shape_cast %184 : vector<16xf32> to vector<16x1xf32>
    %cst_64 = arith.constant 3.200000e+01 : f32
    %186 = vector.broadcast %cst_64 : f32 to vector<16x1xf32>
    %187 = arith.divf %185, %186 : vector<16x1xf32>
    %188 = vector.broadcast %180 : vector<16x1xf32> to vector<16x32xf32>
    %189 = arith.subf %174, %188 : vector<16x32xf32>
    %cst_65 = arith.constant 9.99999996E-13 : f32
    %190 = vector.broadcast %cst_65 : f32 to vector<16x1xf32>
    %191 = arith.addf %187, %190 : vector<16x1xf32>
    %192 = math.rsqrt %191 : vector<16x1xf32>
    %193 = vector.broadcast %192 : vector<16x1xf32> to vector<16x32xf32>
    %194 = arith.mulf %189, %193 : vector<16x32xf32>
    %195 = vector.broadcast %175 : vector<1x32xf32> to vector<16x32xf32>
    %196 = arith.mulf %194, %195 : vector<16x32xf32>
    %197 = vector.broadcast %176 : vector<1x32xf32> to vector<16x32xf32>
    %198 = arith.addf %196, %197 : vector<16x32xf32>
    %cst_66 = arith.constant 0.000000e+00 : f32
    %199 = vector.broadcast %cst_66 : f32 to vector<16x96xf32>
    %200 = tpu.concatenate %198, %199 in 1 : vector<16x32xf32>, vector<16x96xf32> -> vector<16x128xf32>
    %c0_67 = arith.constant 0 : index
    %c0_68 = arith.constant 0 : index
    %201 = vector.load %arg10[%c0_67, %c0_68] : memref<16x128xf32, #tpu.memory_space<vmem>>, vector<16x128xf32>
    tpu.vector_store %arg10[%c0_67, %c0_68], %200 {strides = array<i32>} : memref<16x128xf32, #tpu.memory_space<vmem>>, vector<16x128xf32>,
    return
  }
}

</mosaic_0001>

<bundles_post_ra>
// kernel: resnet_bert_forward.5
= control target key start
LH: loop header
LB: loop body
LE: loop exit
PB: predicated region body
PF: predicated region fallthrough
CT: control target
= control target key end

     0   :  { %s371_s3 = inlined_call_operand.vmem [shape: bf16[128,128], index: 3, kind: input, shape index: {}]   ;;  %s372_s2 = inlined_call_operand.vmem [shape: bf16[128,128], index: 2, kind: input, shape index: {}]   ;;  %s373_s4 = inlined_call_operand.vmem [shape: f32[1,128], index: 4, kind: input, shape index: {}]   ;;  %s374_s1 = inlined_call_operand.vmem [shape: f32[16,128], index: 1, kind: input, shape index: {}]   ;;  %s375_s0 = inlined_call_operand.vmem [shape: f32[2,128], index: 0, kind: input, shape index: {}]   ;;  %s376_s5 = inlined_call_operand.vmem [shape: f32[16,128], index: 5, kind: output, shape index: {}]  }
   0x1   :  { %v265_v0 = vld [vmem:[%s371_s3 + $0x38] sm:$0xff]  ;;  %v264_v2 = vld [vmem:[%s371_s3 + $0x30] sm:$0xff]  ;;  %v263_v4 = vld [vmem:[%s371_s3 + $0x28] sm:$0xff] }
   0x2   :  { %v273_v1 = vld [vmem:[%s372_s2 + $0x38] sm:$0xff]  ;;  %91 = vmatpush.bf16.msra.mxu0 %v265_v0  ;;  %v272_v3 = vld [vmem:[%s372_s2 + $0x30] sm:$0xff]  ;;  %v271_v5 = vld [vmem:[%s372_s2 + $0x28] sm:$0xff] }
   0x3   :  { %171 = vmatpush.bf16.msra.mxu1 %v273_v1  ;;  %v262_v6 = vld [vmem:[%s371_s3 + $0x20] sm:$0xff]  ;;  %v261_v8 = vld [vmem:[%s371_s3 + $0x18] sm:$0xff]  ;;  %v260_v10 = vld [vmem:[%s371_s3 + $0x10] sm:$0xff] }
   0x4   :  { %v270_v7 = vld [vmem:[%s372_s2 + $0x20] sm:$0xff]  ;;  %v269_v9 = vld [vmem:[%s372_s2 + $0x18] sm:$0xff]  ;;  %v268_v11 = vld [vmem:[%s372_s2 + $0x10] sm:$0xff] }
   0x5   :  { %v259_v12 = vld [vmem:[%s371_s3 + $0x8] sm:$0xff]  ;;  %v258_v14 = vld [vmem:[%s371_s3] sm:$0xff] }
   0x6   :  { %92 = vmatpush.bf16.msra.mxu0 %v264_v2  ;;  %v267_v13 = vld [vmem:[%s372_s2 + $0x8] sm:$0xff]  ;;  %v266_v15 = vld [vmem:[%s372_s2] sm:$0xff] }
   0x7   :  { %172 = vmatpush.bf16.msra.mxu1 %v272_v3  ;;  %v20_v16 = vld [vmem:[%s374_s1] sm:$0xff]  ;;  %v21_v17 = vld [vmem:[%s374_s1 + $0x8] sm:$0xff] }
   0x8   :  { %v105_v18 = vld [vmem:[%s375_s0] sm:$0x3]  ;;  %v22_v19 = vpack.c.bf16 %v21_v17, %v20_v16 }
   0x9   :  { %v106_v20 = vpack.c.bf16 %v105_v18, %v105_v18  ;;  %v274_v21 = vld [vmem:[%s373_s4] ss:$0 sm:$0xff] }
   0xa   :  { %93 = vmatpush.bf16.msra.mxu0 %v263_v4 }
   0xb   :  { %173 = vmatpush.bf16.msra.mxu1 %v271_v5 }
   0xe   :  { %94 = vmatpush.bf16.msra.mxu0 %v262_v6 }
   0xf   :  { %174 = vmatpush.bf16.msra.mxu1 %v270_v7 }
  0x12   :  { %95 = vmatpush.bf16.msra.mxu0 %v261_v8 }
  0x13   :  { %175 = vmatpush.bf16.msra.mxu1 %v269_v9 }
  0x16   :  { %96 = vmatpush.bf16.msra.mxu0 %v260_v10 }
  0x17   :  { %176 = vmatpush.bf16.msra.mxu1 %v268_v11 }
  0x1a   :  { %97 = vmatpush.bf16.msra.mxu0 %v259_v12 }
  0x1b   :  { %177 = vmatpush.bf16.msra.mxu1 %v267_v13 }
  0x1e   :  { %98 = vmatpush.bf16.msra.mxu0 %v258_v14 }
  0x1f   :  { %178 = vmatpush.bf16.msra.mxu1 %v266_v15 }
  0x21   :  { %99 = vmatmul.bf16.vlgmr.msra.gmra.mxu0 %v22_v19 }
  0x22   :  { %179 = vmatmul.bf16.vlgmr.msra.gmra.mxu1 %v106_v20 }
  0x9e   :  { %v100_v22 = vpop.f32.mrf.mxu0 }
  0x9f   :  { %v180_v23 = vpop.f32.mrf.mxu1  ;;  %v101_v24 = vadd.f32 %v274_v21, %v100_v22 }
  0xa0   :  { %v184_v25 = vperm.slane %v180_v23, 0  ;;  %v187_v29 = vperm.slane %v180_v23, 1 }
  0xa2   :  { %v185_v26 = vadd.f32 %v184_v25, %v101_v24 }
  0xa4   :  { %186 = vst [vmem:[%s376_s5] sm:$0xff] %v185_v26 }
  0xa6   :  { %v102_v27 = vpop.f32.mrf.mxu0 }
  0xa7   :  { %v182_v28 = vpop.f32.mrf.mxu1  ;;  %v103_v30 = vadd.f32 %v274_v21, %v102_v27 }
  0xa9   :  { %v188_v31 = vadd.f32 %v187_v29, %v103_v30 }
  0xab   :  { %189 = vst [vmem:[%s376_s5 + $0x8] sm:$0xff] %v188_v31 }

// kernel: resnet_bert_forward.4
= control target key start
LH: loop header
LB: loop body
LE: loop exit
PB: predicated region body
PF: predicated region fallthrough
CT: control target
= control target key end

     0   :  { %vm40_vm0 = vcmask 261120   ;;  %v760_v4 = vmov 32.0   ;;  %s761_s25 = smov 112   ;;  %s762_s26 = smov 96   ;;  %vm140_vm8 = vcmask 130048   ;;  %vm161_vm9 = vcmask 64512   ;;  %s959_s0 = inlined_call_operand.vmem [shape: f32[16,32], index: 0, kind: input, shape index: {}]   ;;  %s960_s1 = inlined_call_operand.vmem [shape: f32[6,32], index: 1, kind: input, shape index: {}]   ;;  %s961_s3 = inlined_call_operand.vmem [shape: f32[1,96], index: 3, kind: input, shape index: {}]   ;;  %s962_s2 = inlined_call_operand.vmem [shape: bf16[32,96], index: 2, kind: input, shape index: {}]   ;;  %s963_s5 = inlined_call_operand.vmem [shape: f32[1,32], index: 5, kind: input, shape index: {}]   ;;  %s964_s4 = inlined_call_operand.vmem [shape: bf16[32,32], index: 4, kind: input, shape index: {}]   ;;  %s965_s7 = inlined_call_operand.vmem [shape: f32[1,64], index: 7, kind: input, shape index: {}]   ;;  %s966_s6 = inlined_call_operand.vmem [shape: bf16[32,64], index: 6, kind: input, shape index: {}]   ;;  %s967_s9 = inlined_call_operand.vmem [shape: f32[1,32], index: 9, kind: input, shape index: {}]   ;;  %s968_s8 = inlined_call_operand.vmem [shape: bf16[64,32], index: 8, kind: input, shape index: {}]   ;;  %s969_s10 = inlined_call_operand.vmem [shape: f32[16,128], index: 10, kind: output, shape index: {}]  }
   0x1   :  { %v36_v0 = vld [vmem:[%s959_s0] sm:$0xff]  ;;  %v37_v2 = vld [vmem:[%s959_s0 + $0x8] sm:$0xff]  ;;  %726 = vrcp.f32 %v760_v4  ;;  %s763_s27 = smov 80   ;;  %s765_s28 = smov 48   ;;  %vm179_vm10 = vcmask 1043456  }
   0x2   :  { %v41_v1 = vsel %vm40_vm0, %v36_v0, 0.0  ;;  %v44_v3 = vsel %vm40_vm0, %v37_v2, 0.0  ;;  %v695_v21 = vld [vmem:[%s962_s2 + $0x8] sm:$0xff]  ;;  %v694_v23 = vld [vmem:[%s962_s2] sm:$0xff]  ;;  %s766_s29 = smov 16  }
   0x3   :  { %42 = vadd.xlane.f32.xlu0 %v41_v1  ;;  %128 = vmatpush.bf16.msra.mxu0 %v695_v21  ;;  %v716_v42 = vld [vmem:[%s960_s1] ss:$0 sm:$0xff]  ;;  %v717_v47 = vld [vmem:[%s960_s1 + $0x1] ss:$0 sm:$0xff] }
   0x4   :  { %v718_v52 = vld [vmem:[%s961_s3] ss:$0 sm:$0xff]  ;;  %s764_s3 = smov 64  }
   0x7   :  { %v727_v5 = vpop.eup %726  ;;  %129 = vmatpush.bf16.msra.mxu0 %v694_v23 }
   0x8   :  { %v48_v6 = vmul.f32 32.0, %v727_v5  ;;  %vm52_vm1 = vweird.f32 %v727_v5 }
   0xa   :  { %v49_v7 = vsub.f32 1.0, %v48_v6 }
   0xb   :  { %45 = vadd.xlane.f32.xlu0 %v44_v3 }
   0xc   :  { %v50_v8 = vmul.f32 %v727_v5, %v49_v7 }
   0xe   :  { %v51_v9 = vadd.f32 %v727_v5, %v50_v8 }
  0x10   :  { %v830_v10 = vsel %vm52_vm1, %v727_v5, %v51_v9 }
  0x76   :  { %v43_v11 = vpop.xlane.xlu0 %42 }
  0x77   :  { %v54_v12 = vmul.f32 %v830_v10, %v43_v11 }
  0x79   :  { %v56_v13 = vsub.f32 %v36_v0, %v54_v12 }
  0x7b   :  { %v58_v14 = vmul.f32 %v56_v13, %v56_v13 }
  0x7d   :  { %v60_v15 = vsel %vm40_vm0, %v58_v14, 0.0 }
  0x7e   :  { %61 = vadd.xlane.f32.xlu1 %v60_v15  ;;  %v46_v16 = vpop.xlane.xlu0 %45 }
  0x7f   :  { %v55_v17 = vmul.f32 %v830_v10, %v46_v16 }
  0x81   :  { %v57_v18 = vsub.f32 %v37_v2, %v55_v17 }
  0x83   :  { %v59_v19 = vmul.f32 %v57_v18, %v57_v18 }
  0x85   :  { %v63_v20 = vsel %vm40_vm0, %v59_v19, 0.0 }
  0x86   :  { %64 = vadd.xlane.f32.xlu1 %v63_v20 }
  0xf1   :  { %v62_v22 = vpop.xlane.xlu1 %61 }
  0xf2   :  { %v66_v24 = vmul.f32 %v62_v22, %v830_v10 }
  0xf4   :  { %v68_v25 = vadd.f32 1e-12, %v66_v24 }
  0xf6   :  { %728 = vrsqrt.f32 %v68_v25  ;;  %vm76_vm3 = vweird.f32 %v68_v25 }
  0xf9   :  { %v65_v26 = vpop.xlane.xlu1 %64 }
  0xfa   :  { %v67_v27 = vmul.f32 %v65_v26, %v830_v10 }
  0xfc   :  { %v729_v28 = vpop.eup %728  ;;  %v69_v29 = vadd.f32 1e-12, %v67_v27 }
  0xfd   :  { %v71_v30 = vmul.f32 %v729_v28, %v68_v25  ;;  %vm77_vm2 = vweird.f32 %v729_v28 }
  0xfe   :  { %730 = vrsqrt.f32 %v69_v29  ;;  %vm78_vm4 = vmor %vm76_vm3, %vm77_vm2  ;;  %vm86_vm6 = vweird.f32 %v69_v29  ;;  %vm562_vm2 = vcmask 523264  }
  0xff   :  { %v72_v31 = vmul.f32 %v729_v28, %v71_v30 }
 0x101   :  { %v73_v32 = vmul.f32 0.5, %v72_v31 }
 0x103   :  { %v74_v33 = vsub.f32 1.5, %v73_v32 }
 0x104   :  { %v731_v34 = vpop.eup %730 }
 0x105   :  { %v75_v35 = vmul.f32 %v729_v28, %v74_v33  ;;  %v81_v36 = vmul.f32 %v731_v34, %v69_v29  ;;  %vm87_vm5 = vweird.f32 %v731_v34 }
 0x106   :  { %vm88_vm7 = vmor %vm86_vm6, %vm87_vm5 }
 0x107   :  { %v82_v37 = vmul.f32 %v731_v34, %v81_v36  ;;  %v79_v38 = vsel %vm78_vm4, %v729_v28, %v75_v35 }
 0x108   :  { %v90_v41 = vmul.f32 %v79_v38, %v56_v13 }
 0x109   :  { %v83_v39 = vmul.f32 0.5, %v82_v37 }
 0x10a   :  { %v93_v46 = vmul.f32 %v716_v42, %v90_v41 }
 0x10b   :  { %v84_v40 = vsub.f32 1.5, %v83_v39 }
 0x10c   :  { %v850_v49 = vadd.f32 %v717_v47, %v93_v46 }
 0x10d   :  { %v85_v43 = vmul.f32 %v731_v34, %v84_v40 }
 0x10f   :  { %v89_v44 = vsel %vm88_vm7, %v731_v34, %v85_v43 }
 0x110   :  { %v91_v45 = vmul.f32 %v89_v44, %v57_v18 }
 0x112   :  { %v94_v48 = vmul.f32 %v716_v42, %v91_v45 }
 0x114   :  { %v852_v50 = vadd.f32 %v717_v47, %v94_v48 }
 0x116   :  { %v98_v51 = vpack.c.bf16 %v852_v50, %v850_v49 }
 0x118   :  { %650 = vmatmul.msk.bf16.vlgmr.msra.gmra.mxu0 %vm40_vm0, %v98_v51 }
 0x195   :  { %v131_v53 = vpop.f32.mrf.mxu0 }
 0x196   :  { %v132_v54 = vadd.f32 %v718_v52, %v131_v53 }
 0x198   :  { %v136_v55 = vpack.c.bf16 %v132_v54, %v132_v54 }
 0x19a   :  { %196 = vrot.lane.b32.xlu0 %v136_v55, %s761_s25  ;;  %138 = vrot.lane.b32.xlu2 %v136_v55, %s762_s26 }
 0x19d   :  { %v133_v56 = vpop.f32.mrf.mxu0 }
 0x19e   :  { %v134_v57 = vadd.f32 %v718_v52, %v133_v56 }
 0x1a0   :  { %v258_v58 = vpack.c.bf16 %v134_v57, %v134_v57 }
 0x1a2   :  { %317 = vrot.lane.b32.xlu1 %v258_v58, %s763_s27  ;;  %198 = vrot.lane.b32.xlu2 %v136_v55, %s763_s27 }
 0x1aa   :  { %315 = vrot.lane.b32.xlu2 %v258_v58, %s761_s25 }
 0x1b2   :  { %260 = vrot.lane.b32.xlu2 %v258_v58, %s762_s26 }
 0x1f4   :  { %v139_v59 = vpop.permute.xlu2 %138 }
 0x1f5   :  { %v145_v60 = vsel %vm140_vm8, %v139_v59, 0 }
 0x1f6   :  { %154 = vmatpush.bf16.xpose.msra.mxu1 %v145_v60 }
 0x1fc   :  { %v199_v61 = vpop.permute.xlu2 %198 }
 0x1fd   :  { %651 = vmatmul.msk.bf16.vlgmr.msra.gmra.mxu1 %vm140_vm8, %v136_v55  ;;  %v204_v62 = vsel %vm140_vm8, %v199_v61, 0 }
 0x1fe   :  { %213 = vmatpush.bf16.xpose.msra.mxu3 %v204_v62 }
 0x204   :  { %v316_v63 = vpop.permute.xlu2 %315 }
 0x20c   :  { %v197_v0 = vpop.permute.xlu0 %196  ;;  %v261_v1 = vpop.permute.xlu2 %260 }
 0x20d   :  { %653 = vmatmul.msk.bf16.vlgmr.msra.gmra.mxu3 %vm140_vm8, %v197_v0  ;;  %v266_v2 = vsel %vm140_vm8, %v261_v1, 0 }
 0x20e   :  { %275 = vmatpush.bf16.xpose.msrb.mxu0 %v266_v2 }
 0x214   :  { %v318_v3 = vpop.permute.xlu1 %317 }
 0x215   :  { %655 = vmatmul.msk.bf16.vlgmr.msrb.gmra.mxu0 %vm140_vm8, %v258_v58  ;;  %v323_v4 = vsel %vm140_vm8, %v318_v3, 0 }
 0x216   :  { %332 = vmatpush.bf16.xpose.msrb.mxu3 %v323_v4 }
 0x21d   :  { %657 = vmatmul.msk.bf16.vlgmr.msrb.gmra.mxu3 %vm140_vm8, %v316_v63 }
 0x27a   :  { %v156_v5 = vpop.f32.mrf.mxu1 }
 0x27b   :  { %v160_v6 = vmul.f32 0.25, %v156_v5 }
 0x27d   :  { %v162_v7 = vsel %vm161_vm9, %v160_v6, -inf }
 0x27e   :  { %163 = vmax.xlane.f32.xlu2 %v162_v7 }
 0x282   :  { %v158_v8 = vpop.f32.mrf.mxu1 }
 0x290   :  { %v215_v9 = vpop.f32.mrf.mxu3 }
 0x291   :  { %v219_v11 = vmul.f32 0.25, %v215_v9 }
 0x292   :  { %v277_v12 = vpop.f32.mrf.mxu0 }
 0x293   :  { %v220_v13 = vsel %vm161_vm9, %v219_v11, -inf  ;;  %v281_v30 = vmul.f32 0.25, %v277_v12  ;;  %v697_v12 = vld [vmem:[%s964_s4 + $0x8] sm:$0xff] }
 0x294   :  { %221 = vmax.xlane.f32.xlu0 %v220_v13  ;;  %407 = vmatpush.bf16.msra.mxu0 %v697_v12  ;;  %v696_v13 = vld [vmem:[%s964_s4] sm:$0xff] }
 0x295   :  { %v282_v36 = vsel %vm161_vm9, %v281_v30, -inf  ;;  %v722_v12 = vld [vmem:[%s965_s7] ss:$0 sm:$0xff] }
 0x298   :  { %v217_v14 = vpop.f32.mrf.mxu3  ;;  %408 = vmatpush.bf16.msra.mxu0 %v696_v13 }
 0x29a   :  { %v279_v15 = vpop.f32.mrf.mxu0 }
 0x2a0   :  { %v334_v16 = vpop.f32.mrf.mxu3 }
 0x2a1   :  { %v338_v17 = vmul.f32 0.25, %v334_v16 }
 0x2a3   :  { %v339_v18 = vsel %vm161_vm9, %v338_v17, -inf }
 0x2a4   :  { %340 = vmax.xlane.f32.xlu1 %v339_v18 }
 0x2a8   :  { %174 = vrot.lane.b32.xlu0 %v136_v55, %s764_s3  ;;  %v336_v19 = vpop.f32.mrf.mxu3 }
 0x2b0   :  { %351 = vrot.lane.b32.xlu0 %v258_v58, %s765_s28 }
 0x2b8   :  { %294 = vrot.lane.b32.xlu0 %v258_v58, %s764_s3 }
 0x2bd   :  { %232 = vrot.lane.b32.xlu1 %v136_v55, %s765_s28 }
 0x2f1   :  { %v164_v20 = vpop.xlane.xlu2 %163 }
 0x2f2   :  { %v165_v21 = vsub.f32 %v160_v6, %v164_v20 }
 0x2f4   :  { %v166_v22 = vmul.f32 1.442695, %v165_v21 }
 0x2f6   :  { %732 = vpow2.f32 %v166_v22  ;;  %v719_v22 = vld [vmem:[%s963_s5] ss:$0 sm:$0xff] }
 0x2fc   :  { %v733_v23 = vpop.eup %732 }
 0x2fd   :  { %v168_v24 = vsel %vm161_vm9, %v733_v23, 0.0 }
 0x2fe   :  { %169 = vadd.xlane.f32.xlu2 %v168_v24 }
 0x307   :  { %v222_v25 = vpop.xlane.xlu0 %221 }
 0x308   :  { %v223_v26 = vsub.f32 %v219_v11, %v222_v25 }
 0x30a   :  { %v224_v27 = vmul.f32 1.442695, %v223_v26 }
 0x30c   :  { %734 = vpow2.f32 %v224_v27 }
 0x312   :  { %v735_v28 = vpop.eup %734 }
 0x313   :  { %v226_v29 = vsel %vm161_vm9, %v735_v28, 0.0 }
 0x314   :  { %227 = vadd.xlane.f32.xlu2 %v226_v29 }
 0x317   :  { %v341_v31 = vpop.xlane.xlu1 %340 }
 0x318   :  { %v342_v32 = vsub.f32 %v338_v17, %v341_v31 }
 0x31a   :  { %v343_v33 = vmul.f32 1.442695, %v342_v32  ;;  %v175_v34 = vpop.permute.xlu0 %174 }
 0x31b   :  { %v181_v35 = vsel %vm179_vm10, %v175_v34, 0 }
 0x31c   :  { %736 = vpow2.f32 %v343_v33  ;;  %190 = vmatpush.bf16.msra.mxu2 %v181_v35  ;;  %283 = vmax.xlane.f32.xlu2 %v282_v36 }
 0x322   :  { %v737_v37 = vpop.eup %736  ;;  %v352_v38 = vpop.permute.xlu0 %351 }
 0x323   :  { %v357_v39 = vsel %vm179_vm10, %v352_v38, 0  ;;  %v345_v40 = vsel %vm161_vm9, %v737_v37, 0.0 }
 0x324   :  { %346 = vadd.xlane.f32.xlu2 %v345_v40 }
 0x32a   :  { %v295_v41 = vpop.permute.xlu0 %294 }
 0x32b   :  { %v300_v42 = vsel %vm179_vm10, %v295_v41, 0 }
 0x32c   :  { %309 = vmatpush.bf16.msrb.mxu1 %v300_v42 }
 0x32f   :  { %v233_v43 = vpop.permute.xlu1 %232 }
 0x330   :  { %v238_v44 = vsel %vm179_vm10, %v233_v43, 0  ;;  %v698_v43 = vld [vmem:[%s966_s6] sm:$0xff] }
 0x331   :  { %247 = vmatpush.bf16.msrb.mxu2 %v238_v44 }
 0x371   :  { %v170_v45 = vpop.xlane.xlu2 %169 }
 0x372   :  { %738 = vrcp.f32 %v170_v45 }
 0x378   :  { %v739_v46 = vpop.eup %738 }
 0x379   :  { %v172_v47 = vmul.f32 %v739_v46, %v733_v23 }
 0x37b   :  { %v173_v48 = vpack.c.bf16 %v172_v47, %v172_v47 }
 0x37d   :  { %652 = vmatmul.msk.bf16.vlgmr.msra.gmra.mxu2 %vm161_vm9, %v173_v48 }
 0x37e   :  { %366 = vmatpush.bf16.msra.mxu2 %v357_v39 }
 0x387   :  { %v228_v51 = vpop.xlane.xlu2 %227 }
 0x388   :  { %740 = vrcp.f32 %v228_v51 }
 0x38e   :  { %v741_v52 = vpop.eup %740 }
 0x38f   :  { %v230_v53 = vmul.f32 %v741_v52, %v735_v28  ;;  %v284_v54 = vpop.xlane.xlu2 %283 }
 0x390   :  { %v285_v55 = vsub.f32 %v281_v30, %v284_v54 }
 0x391   :  { %v231_v56 = vpack.c.bf16 %v230_v53, %v230_v53 }
 0x392   :  { %v286_v57 = vmul.f32 1.442695, %v285_v55 }
 0x393   :  { %654 = vmatmul.msk.bf16.vlgmr.msrb.gmra.mxu2 %vm161_vm9, %v231_v56 }
 0x394   :  { %742 = vpow2.f32 %v286_v57 }
 0x397   :  { %v347_v58 = vpop.xlane.xlu2 %346 }
 0x398   :  { %744 = vrcp.f32 %v347_v58 }
 0x39a   :  { %v743_v59 = vpop.eup %742 }
 0x39b   :  { %v288_v60 = vsel %vm161_vm9, %v743_v59, 0.0 }
 0x39c   :  { %289 = vadd.xlane.f32.xlu2 %v288_v60 }
 0x39e   :  { %v745_v61 = vpop.eup %744 }
 0x39f   :  { %v349_v62 = vmul.f32 %v745_v61, %v737_v37  ;;  %v720_v61 = vld [vmem:[%s960_s1 + $0x2] ss:$0 sm:$0xff] }
 0x3a1   :  { %v350_v63 = vpack.c.bf16 %v349_v62, %v349_v62 }
 0x3a3   :  { %658 = vmatmul.msk.bf16.vlgmr.msra.gmra.mxu2 %vm161_vm9, %v350_v63 }
 0x400   :  { %v192_v0 = vpop.f32.mrf.mxu2 }
 0x408   :  { %v194_v1 = vpop.f32.mrf.mxu2 }
 0x409   :  { %v721_v1 = vld [vmem:[%s960_s1 + $0x3] ss:$0 sm:$0xff] }
 0x40f   :  { %v290_v2 = vpop.xlane.xlu2 %289 }
 0x410   :  { %746 = vrcp.f32 %v290_v2 }
 0x416   :  { %v747_v3 = vpop.eup %746  ;;  %v249_v4 = vpop.f32.mrf.mxu2 }
 0x417   :  { %v292_v5 = vmul.f32 %v747_v3, %v743_v59 }
 0x419   :  { %v293_v6 = vpack.c.bf16 %v292_v5, %v292_v5 }
 0x41b   :  { %656 = vmatmul.msk.bf16.vlgmr.msrb.gmra.mxu1 %vm161_vm9, %v293_v6 }
 0x41e   :  { %v251_v7 = vpop.f32.mrf.mxu2 }
 0x426   :  { %v368_v8 = vpop.f32.mrf.mxu2 }
 0x427   :  { %v711_v9 = vpack.i.bf16 %v368_v8, %v249_v4  ;;  %v703_v8 = vld [vmem:[%s968_s8 + $0x18] sm:$0xff] }
 0x428   :  { %570 = vmatpush.bf16.msra.mxu3 %v703_v8 }
 0x429   :  { %712 = vrot.lane.b32.xlu1 %v711_v9, %s766_s29  ;;  %v702_v9 = vld [vmem:[%s968_s8 + $0x10] sm:$0xff] }
 0x42c   :  { %571 = vmatpush.bf16.msra.mxu3 %v702_v9 }
 0x42e   :  { %v370_v11 = vpop.f32.mrf.mxu2 }
 0x42f   :  { %v701_v11 = vld [vmem:[%s968_s8 + $0x8] sm:$0xff] }
 0x430   :  { %572 = vmatpush.bf16.msra.mxu3 %v701_v11 }
 0x498   :  { %v311_v14 = vpop.f32.mrf.mxu1 }
 0x49b   :  { %v713_v15 = vpop.permute.xlu1 %712 }
 0x49c   :  { %v715_v16 = vunpack.i.h.bf16 %v713_v15  ;;  %v714_v17 = vunpack.i.l.bf16 %v713_v15 }
 0x49e   :  { %v257_v18 = vsel %vm140_vm8, %v192_v0, %v714_v17  ;;  %v376_v19 = vsel %vm140_vm8, %v311_v14, %v715_v16  ;;  %v700_v14 = vld [vmem:[%s968_s8] sm:$0xff] }
 0x49f   :  { %v377_v20 = vpack.c.bf16 %v376_v19, %v257_v18  ;;  %573 = vmatpush.bf16.msra.mxu3 %v700_v14 }
 0x4a0   :  { %v313_v21 = vpop.f32.mrf.mxu1 }
 0x4a1   :  { %667 = vmatmul.msk.bf16.vlgmr.msra.gmra.mxu0 %vm40_vm0, %v377_v20 }
 0x51e   :  { %v410_v23 = vpop.f32.mrf.mxu0 }
 0x51f   :  { %v411_v24 = vadd.f32 %v719_v22, %v410_v23 }
 0x521   :  { %v415_v25 = vadd.f32 %v411_v24, %v850_v49 }
 0x523   :  { %v419_v26 = vsel %vm40_vm0, %v415_v25, 0.0 }
 0x524   :  { %420 = vadd.xlane.f32.xlu2 %v419_v26 }
 0x526   :  { %v412_v27 = vpop.f32.mrf.mxu0 }
 0x527   :  { %v413_v28 = vadd.f32 %v719_v22, %v412_v27 }
 0x529   :  { %v416_v29 = vadd.f32 %v413_v28, %v852_v50  ;;  %v699_v50 = vld [vmem:[%s966_s6 + $0x8] sm:$0xff] }
 0x52a   :  { %499 = vmatpush.bf16.msra.mxu1 %v699_v50 }
 0x52b   :  { %v422_v30 = vsel %vm40_vm0, %v416_v29, 0.0 }
 0x52c   :  { %423 = vadd.xlane.f32.xlu0 %v422_v30 }
 0x52e   :  { %500 = vmatpush.bf16.msra.mxu1 %v698_v43 }
 0x597   :  { %v421_v31 = vpop.xlane.xlu2 %420 }
 0x598   :  { %v425_v32 = vmul.f32 %v421_v31, %v830_v10 }
 0x59a   :  { %v427_v33 = vsub.f32 %v415_v25, %v425_v32 }
 0x59c   :  { %v429_v34 = vmul.f32 %v427_v33, %v427_v33 }
 0x59e   :  { %v431_v35 = vsel %vm40_vm0, %v429_v34, 0.0 }
 0x59f   :  { %v424_v36 = vpop.xlane.xlu0 %423  ;;  %432 = vadd.xlane.f32.xlu1 %v431_v35 }
 0x5a0   :  { %v426_v49 = vmul.f32 %v424_v36, %v830_v10 }
 0x5a2   :  { %v428_v37 = vsub.f32 %v416_v29, %v426_v49  ;;  %v723_v49 = vld [vmem:[%s967_s9] ss:$0 sm:$0xff] }
 0x5a4   :  { %v430_v38 = vmul.f32 %v428_v37, %v428_v37 }
 0x5a6   :  { %v434_v39 = vsel %vm40_vm0, %v430_v38, 0.0 }
 0x5a7   :  { %435 = vadd.xlane.f32.xlu2 %v434_v39 }
 0x612   :  { %v433_v40 = vpop.xlane.xlu1 %432 }
 0x613   :  { %v437_v41 = vmul.f32 %v433_v40, %v830_v10 }
 0x615   :  { %v439_v42 = vadd.f32 1e-12, %v437_v41 }
 0x617   :  { %748 = vrsqrt.f32 %v439_v42  ;;  %vm447_vm12 = vweird.f32 %v439_v42 }
 0x61a   :  { %v436_v44 = vpop.xlane.xlu2 %435 }
 0x61b   :  { %v438_v45 = vmul.f32 %v436_v44, %v830_v10 }
 0x61d   :  { %v749_v46 = vpop.eup %748  ;;  %v440_v47 = vadd.f32 1e-12, %v438_v45 }
 0x61e   :  { %v442_v48 = vmul.f32 %v749_v46, %v439_v42  ;;  %vm448_vm11 = vweird.f32 %v749_v46 }
 0x61f   :  { %750 = vrsqrt.f32 %v440_v47  ;;  %vm449_vm13 = vmor %vm447_vm12, %vm448_vm11  ;;  %vm457_vm15 = vweird.f32 %v440_v47 }
 0x620   :  { %v443_v51 = vmul.f32 %v749_v46, %v442_v48 }
 0x622   :  { %v444_v52 = vmul.f32 0.5, %v443_v51 }
 0x624   :  { %v445_v53 = vsub.f32 1.5, %v444_v52 }
 0x625   :  { %v751_v54 = vpop.eup %750 }
 0x626   :  { %v446_v55 = vmul.f32 %v749_v46, %v445_v53  ;;  %v452_v56 = vmul.f32 %v751_v54, %v440_v47  ;;  %vm458_vm14 = vweird.f32 %v751_v54 }
 0x627   :  { %vm459_vm1 = vmor %vm457_vm15, %vm458_vm14 }
 0x628   :  { %v453_v57 = vmul.f32 %v751_v54, %v452_v56  ;;  %v450_v58 = vsel %vm449_vm13, %v749_v46, %v446_v55 }
 0x629   :  { %v461_v62 = vmul.f32 %v450_v58, %v427_v33 }
 0x62a   :  { %v454_v59 = vmul.f32 0.5, %v453_v57 }
 0x62b   :  { %v464_v2 = vmul.f32 %v720_v61, %v461_v62 }
 0x62c   :  { %v455_v60 = vsub.f32 1.5, %v454_v59 }
 0x62d   :  { %v467_v5 = vadd.f32 %v721_v1, %v464_v2 }
 0x62e   :  { %v456_v63 = vmul.f32 %v751_v54, %v455_v60 }
 0x630   :  { %v460_v0 = vsel %vm459_vm1, %v751_v54, %v456_v63 }
 0x631   :  { %v462_v3 = vmul.f32 %v460_v0, %v428_v37 }
 0x633   :  { %v465_v4 = vmul.f32 %v720_v61, %v462_v3 }
 0x635   :  { %v468_v6 = vadd.f32 %v721_v1, %v465_v4 }
 0x637   :  { %v469_v7 = vpack.c.bf16 %v468_v6, %v467_v5 }
 0x639   :  { %676 = vmatmul.msk.bf16.vlgmr.msra.gmra.mxu1 %vm40_vm0, %v469_v7 }
 0x6b6   :  { %v502_v13 = vpop.f32.mrf.mxu1 }
 0x6b7   :  { %v503_v15 = vadd.f32 %v722_v12, %v502_v13 }
 0x6b9   :  { %v507_v16 = vmul.f32 %v503_v15, %v503_v15 }
 0x6bb   :  { %v509_v17 = vmul.f32 %v507_v16, %v503_v15 }
 0x6bd   :  { %v511_v18 = vmul.f32 0.044715, %v509_v17 }
 0x6be   :  { %v504_v19 = vpop.f32.mrf.mxu1 }
 0x6bf   :  { %v513_v20 = vadd.f32 %v511_v18, %v503_v15  ;;  %v505_v21 = vadd.f32 %v722_v12, %v504_v19 }
 0x6c1   :  { %v515_v22 = vmul.f32 0.7978846, %v513_v20  ;;  %v508_v23 = vmul.f32 %v505_v21, %v505_v21 }
 0x6c3   :  { %v510_v24 = vmul.f32 %v508_v23, %v505_v21  ;;  %752 = vtanh.f32 %v515_v22 }
 0x6c5   :  { %v512_v25 = vmul.f32 0.044715, %v510_v24 }
 0x6c7   :  { %v514_v26 = vadd.f32 %v512_v25, %v505_v21 }
 0x6c9   :  { %v516_v27 = vmul.f32 0.7978846, %v514_v26  ;;  %v753_v28 = vpop.eup %752 }
 0x6ca   :  { %v519_v29 = vadd.f32 1.0, %v753_v28 }
 0x6cb   :  { %754 = vtanh.f32 %v516_v27 }
 0x6cc   :  { %v521_v31 = vmul.f32 0.5, %v519_v29 }
 0x6ce   :  { %v523_v34 = vmul.f32 %v521_v31, %v503_v15 }
 0x6d1   :  { %v755_v30 = vpop.eup %754 }
 0x6d2   :  { %v520_v32 = vadd.f32 1.0, %v755_v30 }
 0x6d4   :  { %v522_v33 = vmul.f32 0.5, %v520_v32 }
 0x6d6   :  { %v524_v35 = vmul.f32 %v522_v33, %v505_v21 }
 0x6d8   :  { %v525_v36 = vpack.c.bf16 %v524_v35, %v523_v34 }
 0x6da   :  { %693 = vmatmul.msk.bf16.vlgmr.msra.gmra.mxu3 %vm562_vm2, %v525_v36 }
 0x75d   :  { %v575_v37 = vpop.f32.mrf.mxu3 }
 0x75e   :  { %v576_v38 = vadd.f32 %v723_v49, %v575_v37 }
 0x760   :  { %v580_v39 = vadd.f32 %v576_v38, %v467_v5 }
 0x762   :  { %v584_v50 = vsel %vm40_vm0, %v580_v39, 0.0 }
 0x763   :  { %585 = vadd.xlane.f32.xlu2 %v584_v50 }
 0x765   :  { %v577_v40 = vpop.f32.mrf.mxu3 }
 0x766   :  { %v578_v41 = vadd.f32 %v723_v49, %v577_v40 }
 0x768   :  { %v581_v42 = vadd.f32 %v578_v41, %v468_v6  ;;  %v724_v6 = vld [vmem:[%s960_s1 + $0x4] ss:$0 sm:$0xff] }
 0x76a   :  { %v587_v43 = vsel %vm40_vm0, %v581_v42, 0.0 }
 0x76b   :  { %588 = vadd.xlane.f32.xlu2 %v587_v43 }
 0x7d6   :  { %v586_v44 = vpop.xlane.xlu2 %585 }
 0x7d7   :  { %v590_v45 = vmul.f32 %v586_v44, %v830_v10 }
 0x7d9   :  { %v592_v46 = vsub.f32 %v580_v39, %v590_v45 }
 0x7db   :  { %v594_v47 = vmul.f32 %v592_v46, %v592_v46 }
 0x7dd   :  { %v596_v48 = vsel %vm40_vm0, %v594_v47, 0.0 }
 0x7de   :  { %597 = vadd.xlane.f32.xlu2 %v596_v48  ;;  %v589_v51 = vpop.xlane.xlu2 %588 }
 0x7df   :  { %v591_v52 = vmul.f32 %v589_v51, %v830_v10 }
 0x7e1   :  { %v593_v53 = vsub.f32 %v581_v42, %v591_v52 }
 0x7e3   :  { %v595_v54 = vmul.f32 %v593_v53, %v593_v53 }
 0x7e5   :  { %v599_v55 = vsel %vm40_vm0, %v595_v54, 0.0 }
 0x7e6   :  { %600 = vadd.xlane.f32.xlu2 %v599_v55 }
 0x851   :  { %v598_v56 = vpop.xlane.xlu2 %597 }
 0x852   :  { %v602_v57 = vmul.f32 %v598_v56, %v830_v10 }
 0x854   :  { %v604_v58 = vadd.f32 1e-12, %v602_v57 }
 0x856   :  { %756 = vrsqrt.f32 %v604_v58  ;;  %vm612_vm4 = vweird.f32 %v604_v58 }
 0x859   :  { %v601_v59 = vpop.xlane.xlu2 %600 }
 0x85a   :  { %v603_v60 = vmul.f32 %v601_v59, %v830_v10  ;;  %v725_v10 = vld [vmem:[%s960_s1 + $0x5] ss:$0 sm:$0xff] }
 0x85c   :  { %v757_v61 = vpop.eup %756  ;;  %v605_v62 = vadd.f32 1e-12, %v603_v60 }
 0x85d   :  { %v607_v63 = vmul.f32 %v757_v61, %v604_v58  ;;  %vm613_vm3 = vweird.f32 %v757_v61 }
 0x85e   :  { %758 = vrsqrt.f32 %v605_v62  ;;  %vm614_vm5 = vmor %vm612_vm4, %vm613_vm3  ;;  %vm622_vm7 = vweird.f32 %v605_v62 }
 0x85f   :  { %v608_v0 = vmul.f32 %v757_v61, %v607_v63 }
 0x861   :  { %v609_v1 = vmul.f32 0.5, %v608_v0 }
 0x863   :  { %v610_v2 = vsub.f32 1.5, %v609_v1 }
 0x864   :  { %v759_v3 = vpop.eup %758 }
 0x865   :  { %v611_v4 = vmul.f32 %v757_v61, %v610_v2  ;;  %v617_v5 = vmul.f32 %v759_v3, %v605_v62  ;;  %vm623_vm6 = vweird.f32 %v759_v3 }
 0x866   :  { %vm624_vm8 = vmor %vm622_vm7, %vm623_vm6 }
 0x867   :  { %v615_v7 = vsel %vm614_vm5, %v757_v61, %v611_v4  ;;  %v618_v8 = vmul.f32 %v759_v3, %v617_v5 }
 0x868   :  { %v626_v9 = vmul.f32 %v615_v7, %v592_v46 }
 0x869   :  { %v619_v11 = vmul.f32 0.5, %v618_v8 }
 0x86a   :  { %v629_v12 = vmul.f32 %v724_v6, %v626_v9 }
 0x86b   :  { %v620_v13 = vsub.f32 1.5, %v619_v11 }
 0x86c   :  { %v632_v14 = vadd.f32 %v725_v10, %v629_v12 }
 0x86d   :  { %v621_v15 = vmul.f32 %v759_v3, %v620_v13 }
 0x86e   :  { %v634_v16 = vsel %vm40_vm0, %v632_v14, 0.0 }
 0x86f   :  { %636 = vst [vmem:[%s969_s10] sm:$0xff] %v634_v16  ;;  %v625_v17 = vsel %vm624_vm8, %v759_v3, %v621_v15 }
 0x870   :  { %v627_v18 = vmul.f32 %v625_v17, %v593_v53 }
 0x872   :  { %v630_v19 = vmul.f32 %v724_v6, %v627_v18 }
 0x874   :  { %v633_v20 = vadd.f32 %v725_v10, %v630_v19 }
 0x876   :  { %v635_v21 = vsel %vm40_vm0, %v633_v20, 0.0 }
 0x877   :  { %637 = vst [vmem:[%s969_s10 + $0x8] sm:$0xff] %v635_v21 }

// kernel: resnet_bert_forward.3
= control target key start
LH: loop header
LB: loop body
LE: loop exit
PB: predicated region body
PF: predicated region fallthrough
CT: control target
= control target key end

     0   :  { %vm54_vm0 = vcmask 1046528   ;;  %vm36_vm1 = vcmask 1045504   ;;  %vm97_vm2 = vcmask 392192   ;;  %vm62_vm3 = vcmask 1044480   ;;  %s1793_s1 = inlined_call_operand.vmem [shape: bf16[3,48,128], index: 1, kind: input, shape index: {}]   ;;  %s1794_s0 = inlined_call_operand.vmem [shape: f32[36,48], index: 0, kind: input, shape index: {}]   ;;  %s1795_s2 = inlined_call_operand.vmem [shape: bf16[3,128,128], index: 2, kind: input, shape index: {}]   ;;  %s1796_s4 = inlined_call_operand.vmem [shape: f32[3,128], index: 4, kind: input, shape index: {}]   ;;  %s1797_s3 = inlined_call_operand.vmem [shape: bf16[3,128,128], index: 3, kind: input, shape index: {}]   ;;  %s1798_s6 = inlined_call_operand.vmem [shape: f32[1,128], index: 6, kind: input, shape index: {}]   ;;  %s1799_s5 = inlined_call_operand.vmem [shape: bf16[128,128], index: 5, kind: input, shape index: {}]   ;;  %s1800_s7 = inlined_call_operand.vmem [shape: f32[2,128], index: 7, kind: output, shape index: {}]  }
   0x1   :  { %v1366_v0 = vld [vmem:[%s1793_s1 + $0x28] sm:$0xff]  ;;  %v1363_v1 = vld [vmem:[%s1793_s1 + $0x10] sm:$0xff]  ;;  %v1369_v2 = vld [vmem:[%s1793_s1 + $0x40] sm:$0xff]  ;;  %vm172_vm4 = vcmask 1043456   ;;  %vm247_vm5 = vcmask 1040384   ;;  %vm1439_vm7 = vmmov 1  }
   0x2   :  { %109 = vmatpush.bf16.msra.mxu0 %v1366_v0  ;;  %152 = vmatpush.bf16.msra.mxu1 %v1363_v1  ;;  %v1365_v3 = vld [vmem:[%s1793_s1 + $0x20] sm:$0xff]  ;;  %v1362_v4 = vld [vmem:[%s1793_s1 + $0x8] sm:$0xff]  ;;  %v1368_v5 = vld [vmem:[%s1793_s1 + $0x38] sm:$0xff]  ;;  %vm264_vm9 = vcmask 1041408   ;;  %vm256_vm10 = vcmask 1042432  }
   0x3   :  { %218 = vmatpush.bf16.msra.mxu2 %v1369_v2  ;;  %v27_v6 = vld [vmem:[%s1794_s0] sm:$0xff]  ;;  %v28_v7 = vld [vmem:[%s1794_s0 + $0x8] sm:$0xff]  ;;  %v29_v8 = vld [vmem:[%s1794_s0 + $0x10] sm:$0xff] }
   0x4   :  { %v55_v9 = vrot.slane %v27_v6, 1  ;;  %v56_v10 = vrot.slane %v28_v7, 1  ;;  %v58_v11 = vrot.slane %v29_v8, 1  ;;  %v37_v12 = vrot.slane %v29_v8, 2  ;;  %v1364_v15 = vld [vmem:[%s1793_s1 + $0x18] sm:$0xff]  ;;  %v1361_v16 = vld [vmem:[%s1793_s1] sm:$0xff]  ;;  %vm1145_vm6 = vmneg %vm247_vm5 }
   0x5   :  { %v166_v13 = vrot.slane %v27_v6, 2  ;;  %v167_v14 = vrot.slane %v28_v7, 2  ;;  %v1367_v19 = vld [vmem:[%s1793_s1 + $0x30] sm:$0xff]  ;;  %v1377_v22 = vld [vmem:[%s1795_s2 + $0x38] sm:$0xff]  ;;  %v44_v24 = vpack.c.bf16 %v28_v7, %v27_v6  ;;  %v31_v28 = vld [vmem:[%s1794_s0 + $0x20] sm:$0xf] }
   0x6   :  { %110 = vmatpush.bf16.msra.mxu0 %v1365_v3  ;;  %153 = vmatpush.bf16.msra.mxu1 %v1362_v4  ;;  %v57_v17 = vsel %vm54_vm0, %v55_v9, %v56_v10  ;;  %v59_v18 = vsel %vm54_vm0, %v56_v10, %v58_v11  ;;  %v1376_v26 = vld [vmem:[%s1795_s2 + $0x30] sm:$0xff]  ;;  %v30_v27 = vld [vmem:[%s1794_s0 + $0x18] sm:$0xff]  ;;  %v63_v29 = vrot.slane %v29_v8, 3  ;;  %v66_v31 = vrot.slane %v31_v28, 3  ;;  %v1375_v46 = vld [vmem:[%s1795_s2 + $0x28] sm:$0xff] }
   0x7   :  { %219 = vmatpush.bf16.msra.mxu2 %v1368_v5  ;;  %v168_v20 = vsel %vm36_vm1, %v166_v13, %v167_v14  ;;  %v169_v21 = vsel %vm36_vm1, %v167_v14, %v37_v12  ;;  %v70_v23 = vpack.c.bf16 %v59_v18, %v57_v17  ;;  %v64_v30 = vrot.slane %v30_v27, 3  ;;  %v1385_v47 = vld [vmem:[%s1795_s2 + $0x78] sm:$0xff]  ;;  %v1374_v49 = vld [vmem:[%s1795_s2 + $0x20] sm:$0xff]  ;;  %v1384_v50 = vld [vmem:[%s1795_s2 + $0x70] sm:$0xff] }
   0x8   :  { %v180_v25 = vpack.c.bf16 %v169_v21, %v168_v20  ;;  %v38_v32 = vrot.slane %v30_v27, 2  ;;  %v40_v33 = vrot.slane %v31_v28, 2  ;;  %v173_v34 = vrot.slane %v29_v8, 4  ;;  %v1393_v48 = vld [vmem:[%s1795_s2 + $0xb8] sm:$0xff]  ;;  %378 = vmatpush.bf16.msra.mxu3 %v1385_v47  ;;  %v1392_v51 = vld [vmem:[%s1795_s2 + $0xb0] sm:$0xff]  ;;  %v1383_v53 = vld [vmem:[%s1795_s2 + $0x68] sm:$0xff] }
   0x9   :  { %v174_v35 = vrot.slane %v30_v27, 4  ;;  %v176_v36 = vrot.slane %v31_v28, 4  ;;  %v65_v37 = vsel %vm62_vm3, %v63_v29, %v64_v30  ;;  %v67_v38 = vsel %vm62_vm3, %v64_v30, %v66_v31  ;;  %v1373_v52 = vld [vmem:[%s1795_s2 + $0x18] sm:$0xff]  ;;  %v1391_v54 = vld [vmem:[%s1795_s2 + $0xa8] sm:$0xff]  ;;  %v1372_v55 = vld [vmem:[%s1795_s2 + $0x10] sm:$0xff] }
   0xa   :  { %111 = vmatpush.bf16.msra.mxu0 %v1364_v15  ;;  %154 = vmatpush.bf16.msra.mxu1 %v1361_v16  ;;  %v39_v39 = vsel %vm36_vm1, %v37_v12, %v38_v32  ;;  %v41_v40 = vsel %vm36_vm1, %v38_v32, %v40_v33  ;;  %v71_v43 = vpack.c.bf16 %v67_v38, %v65_v37  ;;  %v1382_v56 = vld [vmem:[%s1795_s2 + $0x60] sm:$0xff]  ;;  %v1371_v58 = vld [vmem:[%s1795_s2 + $0x8] sm:$0xff]  ;;  %v1381_v59 = vld [vmem:[%s1795_s2 + $0x58] sm:$0xff] }
   0xb   :  { %220 = vmatpush.bf16.msra.mxu2 %v1367_v19  ;;  %v175_v41 = vsel %vm172_vm4, %v173_v34, %v174_v35  ;;  %v177_v42 = vsel %vm172_vm4, %v174_v35, %v176_v36  ;;  %v45_v44 = vpack.c.bf16 %v41_v40, %v39_v39  ;;  %v1390_v57 = vld [vmem:[%s1795_s2 + $0xa0] sm:$0xff]  ;;  %v1389_v60 = vld [vmem:[%s1795_s2 + $0x98] sm:$0xff]  ;;  %v1380_v62 = vld [vmem:[%s1795_s2 + $0x50] sm:$0xff] }
   0xc   :  { %v181_v45 = vpack.c.bf16 %v177_v42, %v175_v41  ;;  %379 = vmatpush.bf16.msra.mxu3 %v1384_v50  ;;  %v1370_v61 = vld [vmem:[%s1795_s2] sm:$0xff]  ;;  %v1388_v63 = vld [vmem:[%s1795_s2 + $0x90] sm:$0xff]  ;;  %v1379_v0 = vld [vmem:[%s1795_s2 + $0x48] sm:$0xff] }
   0xd   :  { %1029 = vmatmul.msk.bf16.vlgmr.msra.gmra.mxu0 %vm97_vm2, %v70_v23  ;;  %1043 = vmatmul.msk.bf16.vlgmr.msra.gmra.mxu1 %vm97_vm2, %v44_v24  ;;  %v1387_v1 = vld [vmem:[%s1795_s2 + $0x88] sm:$0xff]  ;;  %v1378_v4 = vld [vmem:[%s1795_s2 + $0x40] sm:$0xff]  ;;  %vm1625_vm8 = vmpackc.low %vm1439_vm7, %vm1145_vm6 }
   0xe   :  { %445 = vmatpush.bf16.msrb.mxu0 %v1377_v22  ;;  %1063 = vmatmul.msk.bf16.vlgmr.msra.gmra.mxu2 %vm97_vm2, %v180_v25  ;;  %v1386_v5 = vld [vmem:[%s1795_s2 + $0x80] sm:$0xff] }
   0xf   :  { %544 = vmatpush.bf16.msrb.mxu1 %v1393_v48  ;;  %v1435_v11 = vld [vmem:[%s1796_s4] ss:$0 sm:$0xff] }
  0x10   :  { %380 = vmatpush.bf16.msra.mxu3 %v1383_v53 }
  0x12   :  { %446 = vmatpush.bf16.msrb.mxu0 %v1376_v26 }
  0x13   :  { %545 = vmatpush.bf16.msrb.mxu1 %v1392_v51 }
  0x14   :  { %381 = vmatpush.bf16.msra.mxu3 %v1382_v56 }
  0x16   :  { %447 = vmatpush.bf16.msrb.mxu0 %v1375_v46 }
  0x17   :  { %546 = vmatpush.bf16.msrb.mxu1 %v1391_v54 }
  0x18   :  { %382 = vmatpush.bf16.msra.mxu3 %v1381_v59 }
  0x1a   :  { %448 = vmatpush.bf16.msrb.mxu0 %v1374_v49 }
  0x1b   :  { %547 = vmatpush.bf16.msrb.mxu1 %v1390_v57 }
  0x1c   :  { %383 = vmatpush.bf16.msra.mxu3 %v1380_v62 }
  0x1d   :  { %1030 = vmatmul.msk.bf16.gmra.mxu0 %vm97_vm2, %v71_v43  ;;  %1044 = vmatmul.msk.bf16.gmra.mxu1 %vm97_vm2, %v45_v44 }
  0x1e   :  { %1064 = vmatmul.msk.bf16.gmra.mxu2 %vm97_vm2, %v181_v45  ;;  %449 = vmatpush.bf16.msrb.mxu0 %v1373_v52 }
  0x1f   :  { %548 = vmatpush.bf16.msrb.mxu1 %v1389_v60 }
  0x20   :  { %384 = vmatpush.bf16.msra.mxu3 %v1379_v0 }
  0x22   :  { %450 = vmatpush.bf16.msrb.mxu0 %v1372_v55 }
  0x23   :  { %549 = vmatpush.bf16.msrb.mxu1 %v1388_v63 }
  0x24   :  { %385 = vmatpush.bf16.msra.mxu3 %v1378_v4 }
  0x26   :  { %451 = vmatpush.bf16.msrb.mxu0 %v1371_v58 }
  0x27   :  { %550 = vmatpush.bf16.msrb.mxu1 %v1387_v1 }
  0x2a   :  { %452 = vmatpush.bf16.msrb.mxu0 %v1370_v61 }
  0x2b   :  { %551 = vmatpush.bf16.msrb.mxu1 %v1386_v5 }
  0x8a   :  { %v113_v2 = vpop.f32.mrf.mxu0  ;;  %v156_v3 = vpop.f32.mrf.mxu1 }
  0x8b   :  { %v157_v6 = vadd.f32 %v156_v3, %v113_v2 }
  0x91   :  { %v222_v7 = vpop.f32.mrf.mxu2 }
  0x92   :  { %v115_v8 = vpop.f32.mrf.mxu0  ;;  %v158_v9 = vpop.f32.mrf.mxu1  ;;  %v232_v10 = vadd.f32 %v222_v7, %v157_v6 }
  0x93   :  { %v159_v13 = vadd.f32 %v158_v9, %v115_v8 }
  0x94   :  { %v1613_v12 = vadd.f32 %v1435_v11, %v232_v10 }
  0x96   :  { %v241_v18 = vmax.f32 %v1613_v12, 0.0 }
  0x98   :  { %v248_v22 = vrot.slane %v241_v18, 7 }
  0x99   :  { %v224_v14 = vpop.f32.mrf.mxu2 }
  0x9a   :  { %v233_v15 = vadd.f32 %v224_v14, %v159_v13  ;;  %v118_v16 = vpop.f32.mrf.mxu0  ;;  %v161_v17 = vpop.f32.mrf.mxu1  ;;  %v262_v36 = vsel %vm247_vm5, 0.0, %v248_v22  ;;  %v1400_v13 = vld [vmem:[%s1797_s3 + $0x30] sm:$0xff]  ;;  %v1399_v14 = vld [vmem:[%s1797_s3 + $0x28] sm:$0xff] }
  0x9b   :  { %v162_v21 = vadd.f32 %v161_v17, %v118_v16  ;;  %v297_v43 = vrot.slane %v262_v36, 1  ;;  %v464_v45 = vrot.slane %v262_v36, 2  ;;  %v1417_v16 = vld [vmem:[%s1797_s3 + $0xb8] sm:$0xff]  ;;  %v1398_v17 = vld [vmem:[%s1797_s3 + $0x20] sm:$0xff]  ;;  %v1404_v36 = vld [vmem:[%s1797_s3 + $0x50] sm:$0xff] }
  0x9c   :  { %v1616_v19 = vadd.f32 %v1435_v11, %v233_v15  ;;  %v1409_v15 = vld [vmem:[%s1797_s3 + $0x78] sm:$0xff]  ;;  %872 = vmatpush.bf16.msra.mxu0 %v1417_v16 }
  0x9d   :  { %706 = vmatpush.bf16.msrb.mxu2 %v1409_v15 }
  0x9e   :  { %v242_v20 = vmax.f32 %v1616_v19, 0.0 }
  0xa0   :  { %v249_v23 = vrot.slane %v242_v20, 7 }
  0xa1   :  { %v227_v24 = vpop.f32.mrf.mxu2 }
  0xa2   :  { %v250_v25 = vsel %vm247_vm5, %v248_v22, %v249_v23  ;;  %v234_v26 = vadd.f32 %v227_v24, %v162_v21  ;;  %v120_v30 = vpop.f32.mrf.mxu0  ;;  %v163_v31 = vpop.f32.mrf.mxu1  ;;  %v263_v32 = vsel %vm247_vm5, %v249_v23, 0.0  ;;  %v1408_v21 = vld [vmem:[%s1797_s3 + $0x70] sm:$0xff]  ;;  %v1397_v23 = vld [vmem:[%s1797_s3 + $0x18] sm:$0xff]  ;;  %v1407_v24 = vld [vmem:[%s1797_s3 + $0x68] sm:$0xff] }
  0xa3   :  { %v1147_v28 = vpack.c.bf16 %v250_v25, %v248_v22  ;;  %v164_v35 = vadd.f32 %v163_v31, %v120_v30  ;;  %v265_v37 = vsel %vm264_vm9, %v263_v32, 0.0  ;;  %v298_v39 = vrot.slane %v250_v25, 1  ;;  %v1416_v22 = vld [vmem:[%s1797_s3 + $0xb0] sm:$0xff]  ;;  %707 = vmatpush.bf16.msrb.mxu2 %v1408_v21  ;;  %v1414_v30 = vld [vmem:[%s1797_s3 + $0xa0] sm:$0xff]  ;;  %v1395_v31 = vld [vmem:[%s1797_s3 + $0x8] sm:$0xff] }
  0xa4   :  { %v1629_v29 = vadd.f32 %v1435_v11, %v234_v26  ;;  %v465_v40 = vrot.slane %v250_v25, 2  ;;  %873 = vmatpush.bf16.msra.mxu0 %v1416_v22  ;;  %v1415_v25 = vld [vmem:[%s1797_s3 + $0xa8] sm:$0xff]  ;;  %v1396_v26 = vld [vmem:[%s1797_s3 + $0x10] sm:$0xff]  ;;  %v1405_v32 = vld [vmem:[%s1797_s3 + $0x58] sm:$0xff] }
  0xa5   :  { %1148 = vmatmul.msk.bf16.vlgmr.msrb.gmra.mxu0 %vm1625_vm8, %v1147_v28  ;;  %v299_v48 = vsel %vm54_vm0, %v297_v43, %v298_v39  ;;  %v1406_v28 = vld [vmem:[%s1797_s3 + $0x60] sm:$0xff] }
  0xa6   :  { %v243_v33 = vmax.f32 %v1629_v29, 0.0  ;;  %v466_v50 = vsel %vm36_vm1, %v464_v45, %v465_v40  ;;  %v1410_v43 = vld [vmem:[%s1797_s3 + $0x80] sm:$0xff] }
  0xa7   :  { %708 = vmatpush.bf16.msrb.mxu2 %v1407_v24 }
  0xa8   :  { %v257_v34 = vrot.slane %v243_v33, 5  ;;  %874 = vmatpush.bf16.msra.mxu0 %v1415_v25 }
  0xa9   :  { %v229_v38 = vpop.f32.mrf.mxu2 }
  0xaa   :  { %v266_v41 = vsel %vm256_vm10, %v265_v37, %v257_v34  ;;  %v235_v42 = vadd.f32 %v229_v38, %v164_v35  ;;  %v1394_v35 = vld [vmem:[%s1797_s3] sm:$0xff]  ;;  %v1412_v37 = vld [vmem:[%s1797_s3 + $0x90] sm:$0xff]  ;;  %v1403_v38 = vld [vmem:[%s1797_s3 + $0x48] sm:$0xff] }
  0xab   :  { %v300_v44 = vrot.slane %v266_v41, 1  ;;  %v271_v46 = vrot.slane %v266_v41, 2  ;;  %v304_v3 = vrot.slane %v266_v41, 3  ;;  %v470_v4 = vrot.slane %v266_v41, 4  ;;  %709 = vmatpush.bf16.msrb.mxu2 %v1406_v28 }
  0xac   :  { %v1640_v47 = vadd.f32 %v1435_v11, %v235_v42  ;;  %v1401_v11 = vld [vmem:[%s1797_s3 + $0x38] sm:$0xff]  ;;  %875 = vmatpush.bf16.msra.mxu0 %v1414_v30  ;;  %v1402_v42 = vld [vmem:[%s1797_s3 + $0x40] sm:$0xff] }
  0xad   :  { %v301_v49 = vsel %vm54_vm0, %v298_v39, %v300_v44  ;;  %v467_v51 = vsel %vm36_vm1, %v465_v40, %v271_v46  ;;  %773 = vmatpush.bf16.msrb.mxu3 %v1401_v11  ;;  %v1411_v39 = vld [vmem:[%s1797_s3 + $0x88] sm:$0xff] }
  0xae   :  { %v244_v52 = vmax.f32 %v1640_v47, 0.0  ;;  %v311_v53 = vpack.c.bf16 %v301_v49, %v299_v48  ;;  %v477_v54 = vpack.c.bf16 %v467_v51, %v466_v50  ;;  %v1436_v48 = vld [vmem:[%s1796_s4 + $0x1] ss:$0 sm:$0xff]  ;;  %v1438_v47 = vld [vmem:[%s1798_s6] ss:$0 sm:$0xff] }
  0xaf   :  { %710 = vmatpush.bf16.msrb.mxu2 %v1405_v32 }
  0xb0   :  { %v258_v55 = vrot.slane %v244_v52, 5  ;;  %386 = vmatmul.bf16.vlgmr.msra.gmra.mxu3 %v311_v53  ;;  %552 = vmatmul.bf16.vlgmr.msrb.gmra.mxu1 %v477_v54 }
  0xb1   :  { %774 = vmatpush.bf16.msrb.mxu3 %v1400_v13 }
  0xb2   :  { %v267_v56 = vsel %vm256_vm10, %v258_v55, 0.0  ;;  %v259_v57 = vsel %vm256_vm10, %v257_v34, %v258_v55  ;;  %v1413_v34 = vld [vmem:[%s1797_s3 + $0x98] sm:$0xff] }
  0xb3   :  { %v272_v58 = vrot.slane %v259_v57, 2  ;;  %v274_v59 = vrot.slane %v267_v56, 2  ;;  %v305_v63 = vrot.slane %v259_v57, 3  ;;  %v307_v0 = vrot.slane %v267_v56, 3  ;;  %876 = vmatpush.bf16.msra.mxu0 %v1413_v34  ;;  %711 = vmatpush.bf16.msrb.mxu2 %v1404_v36 }
  0xb4   :  { %v471_v1 = vrot.slane %v259_v57, 4  ;;  %v473_v2 = vrot.slane %v267_v56, 4 }
  0xb5   :  { %v273_v60 = vsel %vm36_vm1, %v271_v46, %v272_v58  ;;  %v275_v61 = vsel %vm36_vm1, %v272_v58, %v274_v59  ;;  %v306_v5 = vsel %vm62_vm3, %v304_v3, %v305_v63  ;;  %v308_v6 = vsel %vm62_vm3, %v305_v63, %v307_v0  ;;  %775 = vmatpush.bf16.msrb.mxu3 %v1399_v14 }
  0xb6   :  { %v279_v62 = vpack.c.bf16 %v275_v61, %v273_v60  ;;  %v472_v7 = vsel %vm172_vm4, %v470_v4, %v471_v1  ;;  %v474_v8 = vsel %vm172_vm4, %v471_v1, %v473_v2  ;;  %v312_v9 = vpack.c.bf16 %v308_v6, %v306_v5 }
  0xb7   :  { %v478_v10 = vpack.c.bf16 %v474_v8, %v472_v7  ;;  %877 = vmatpush.bf16.msra.mxu0 %v1412_v37  ;;  %712 = vmatpush.bf16.msrb.mxu2 %v1403_v38 }
  0xb8   :  { %458 = vmatmul.bf16.gmra.mxu0 %v279_v62 }
  0xb9   :  { %776 = vmatpush.bf16.msrb.mxu3 %v1398_v17 }
  0xbb   :  { %878 = vmatpush.bf16.msra.mxu0 %v1411_v39  ;;  %713 = vmatpush.bf16.msrb.mxu2 %v1402_v42 }
  0xbd   :  { %777 = vmatpush.bf16.msrb.mxu3 %v1397_v23 }
  0xbf   :  { %879 = vmatpush.bf16.msra.mxu0 %v1410_v43  ;;  %1426 = vmatpush.bf16.msra.mxu2 %v1417_v16 }
  0xc0   :  { %391 = vmatmul.bf16.gmra.mxu3 %v312_v9  ;;  %557 = vmatmul.bf16.gmra.mxu1 %v478_v10 }
  0xc1   :  { %778 = vmatpush.bf16.msrb.mxu3 %v1396_v26 }
  0xc3   :  { %1427 = vmatpush.bf16.msra.mxu2 %v1416_v22 }
  0xc5   :  { %779 = vmatpush.bf16.msrb.mxu3 %v1395_v31 }
  0xc7   :  { %1428 = vmatpush.bf16.msra.mxu2 %v1415_v25 }
  0xc9   :  { %780 = vmatpush.bf16.msrb.mxu3 %v1394_v35 }
  0xcb   :  { %1429 = vmatpush.bf16.msra.mxu2 %v1414_v30 }
  0xcf   :  { %1430 = vmatpush.bf16.msra.mxu2 %v1413_v34 }
  0xd3   :  { %1431 = vmatpush.bf16.msra.mxu2 %v1412_v37 }
  0xd7   :  { %1432 = vmatpush.bf16.msra.mxu2 %v1411_v39 }
  0xdb   :  { %1433 = vmatpush.bf16.msra.mxu2 %v1410_v43 }
 0x122   :  { %v454_v40 = vpop.f32.mrf.mxu0 }
 0x12a   :  { %v456_v49 = vpop.f32.mrf.mxu0 }
 0x12d   :  { %v553_v41 = vpop.f32.mrf.mxu1 }
 0x133   :  { %v387_v44 = vpop.f32.mrf.mxu3 }
 0x134   :  { %v455_v45 = vadd.f32 %v454_v40, %v387_v44 }
 0x135   :  { %v555_v50 = vpop.f32.mrf.mxu1  ;;  %v459_v58 = vpop.f32.mrf.mxu0 }
 0x136   :  { %v563_v46 = vadd.f32 %v553_v41, %v455_v45 }
 0x138   :  { %v568_v53 = vadd.f32 %v1436_v48, %v563_v46 }
 0x13a   :  { %v572_v56 = vmax.f32 %v568_v53, 0.0 }
 0x13b   :  { %v389_v51 = vpop.f32.mrf.mxu3 }
 0x13c   :  { %v457_v54 = vadd.f32 %v456_v49, %v389_v51  ;;  %v578_v62 = vrot.slane %v572_v56, 7 }
 0x13d   :  { %v558_v60 = vpop.f32.mrf.mxu1  ;;  %v461_v7 = vpop.f32.mrf.mxu0 }
 0x13e   :  { %v564_v55 = vadd.f32 %v555_v50, %v457_v54  ;;  %v591_v9 = vsel %vm247_vm5, 0.0, %v578_v62 }
 0x13f   :  { %v792_v27 = vrot.slane %v591_v9, 2  ;;  %v625_v22 = vrot.slane %v591_v9, 1 }
 0x140   :  { %v569_v57 = vadd.f32 %v1436_v48, %v564_v55 }
 0x142   :  { %v573_v59 = vmax.f32 %v569_v57, 0.0 }
 0x143   :  { %v392_v61 = vpop.f32.mrf.mxu3 }
 0x144   :  { %v579_v63 = vrot.slane %v573_v59, 7  ;;  %v460_v0 = vadd.f32 %v459_v58, %v392_v61  ;;  %v1425_v59 = vld [vmem:[%s1799_s5 + $0x38] sm:$0xff] }
 0x145   :  { %v560_v14 = vpop.f32.mrf.mxu1  ;;  %993 = vmatpush.bf16.msra.mxu1 %v1425_v59 }
 0x146   :  { %v565_v1 = vadd.f32 %v558_v60, %v460_v0  ;;  %v580_v2 = vsel %vm247_vm5, %v578_v62, %v579_v63  ;;  %v592_v5 = vsel %vm247_vm5, %v579_v63, 0.0  ;;  %v1423_v0 = vld [vmem:[%s1799_s5 + $0x28] sm:$0xff] }
 0x147   :  { %v1279_v3 = vpack.c.bf16 %v580_v2, %v578_v62  ;;  %v593_v13 = vsel %vm264_vm9, %v592_v5, 0.0  ;;  %v793_v15 = vrot.slane %v580_v2, 2  ;;  %v626_v16 = vrot.slane %v580_v2, 1  ;;  %v1424_v62 = vld [vmem:[%s1799_s5 + $0x30] sm:$0xff] }
 0x148   :  { %v570_v4 = vadd.f32 %v1436_v48, %v565_v1 }
 0x149   :  { %1280 = vmatmul.msk.bf16.vlgmr.msrb.gmra.mxu3 %vm1625_vm8, %v1279_v3  ;;  %v627_v26 = vsel %vm54_vm0, %v625_v22, %v626_v16  ;;  %v794_v30 = vsel %vm36_vm1, %v792_v27, %v793_v15  ;;  %994 = vmatpush.bf16.msra.mxu1 %v1424_v62  ;;  %v1422_v3 = vld [vmem:[%s1799_s5 + $0x20] sm:$0xff] }
 0x14a   :  { %v574_v6 = vmax.f32 %v570_v4, 0.0  ;;  %v1418_v27 = vld [vmem:[%s1799_s5] sm:$0xff] }
 0x14b   :  { %v394_v8 = vpop.f32.mrf.mxu3 }
 0x14c   :  { %v586_v10 = vrot.slane %v574_v6, 5  ;;  %v462_v11 = vadd.f32 %v461_v7, %v394_v8  ;;  %v1421_v7 = vld [vmem:[%s1799_s5 + $0x18] sm:$0xff] }
 0x14d   :  { %995 = vmatpush.bf16.msra.mxu1 %v1423_v0 }
 0x14e   :  { %v594_v17 = vsel %vm256_vm10, %v593_v13, %v586_v10  ;;  %v566_v21 = vadd.f32 %v560_v14, %v462_v11  ;;  %v1420_v13 = vld [vmem:[%s1799_s5 + $0x10] sm:$0xff] }
 0x14f   :  { %v628_v23 = vrot.slane %v594_v17, 1  ;;  %v599_v24 = vrot.slane %v594_v17, 2  ;;  %v632_v46 = vrot.slane %v594_v17, 3  ;;  %v798_v54 = vrot.slane %v594_v17, 4 }
 0x150   :  { %v571_v25 = vadd.f32 %v1436_v48, %v566_v21 }
 0x151   :  { %v629_v28 = vsel %vm54_vm0, %v626_v16, %v628_v23  ;;  %v795_v31 = vsel %vm36_vm1, %v793_v15, %v599_v24  ;;  %996 = vmatpush.bf16.msra.mxu1 %v1422_v3  ;;  %v1419_v16 = vld [vmem:[%s1799_s5 + $0x8] sm:$0xff] }
 0x152   :  { %v575_v32 = vmax.f32 %v571_v25, 0.0  ;;  %v639_v34 = vpack.c.bf16 %v629_v28, %v627_v26  ;;  %v805_v35 = vpack.c.bf16 %v795_v31, %v794_v30 }
 0x154   :  { %v587_v36 = vrot.slane %v575_v32, 5  ;;  %714 = vmatmul.bf16.vlgmr.msrb.gmra.mxu2 %v639_v34  ;;  %880 = vmatmul.bf16.vlgmr.msra.gmra.mxu0 %v805_v35 }
 0x155   :  { %997 = vmatpush.bf16.msra.mxu1 %v1421_v7 }
 0x156   :  { %v595_v37 = vsel %vm256_vm10, %v587_v36, 0.0  ;;  %v588_v38 = vsel %vm256_vm10, %v586_v10, %v587_v36  ;;  %v1437_v10 = vld [vmem:[%s1796_s4 + $0x2] ss:$0 sm:$0xff] }
 0x157   :  { %v600_v39 = vrot.slane %v588_v38, 2  ;;  %v602_v40 = vrot.slane %v595_v37, 2  ;;  %v633_v44 = vrot.slane %v588_v38, 3  ;;  %v635_v45 = vrot.slane %v595_v37, 3 }
 0x158   :  { %v801_v51 = vrot.slane %v595_v37, 4  ;;  %v799_v53 = vrot.slane %v588_v38, 4 }
 0x159   :  { %v601_v41 = vsel %vm36_vm1, %v599_v24, %v600_v39  ;;  %v603_v42 = vsel %vm36_vm1, %v600_v39, %v602_v40  ;;  %v634_v48 = vsel %vm62_vm3, %v632_v46, %v633_v44  ;;  %v636_v49 = vsel %vm62_vm3, %v633_v44, %v635_v45  ;;  %998 = vmatpush.bf16.msra.mxu1 %v1420_v13 }
 0x15a   :  { %v607_v43 = vpack.c.bf16 %v603_v42, %v601_v41  ;;  %v640_v50 = vpack.c.bf16 %v636_v49, %v634_v48  ;;  %v800_v55 = vsel %vm172_vm4, %v798_v54, %v799_v53  ;;  %v802_v56 = vsel %vm172_vm4, %v799_v53, %v801_v51 }
 0x15b   :  { %v806_v57 = vpack.c.bf16 %v802_v56, %v800_v55 }
 0x15c   :  { %786 = vmatmul.bf16.gmra.mxu3 %v607_v43 }
 0x15d   :  { %999 = vmatpush.bf16.msra.mxu1 %v1419_v16 }
 0x161   :  { %1000 = vmatpush.bf16.msra.mxu1 %v1418_v27 }
 0x164   :  { %719 = vmatmul.bf16.gmra.mxu2 %v640_v50 }
 0x174   :  { %885 = vmatmul.bf16.vlgmr.msra.gmra.mxu2 %v806_v57 }
 0x1cc   :  { %v782_v60 = vpop.f32.mrf.mxu3 }
 0x1d1   :  { %v881_v63 = vpop.f32.mrf.mxu0 }
 0x1d4   :  { %v784_v1 = vpop.f32.mrf.mxu3 }
 0x1d7   :  { %v715_v58 = vpop.f32.mrf.mxu2 }
 0x1d8   :  { %v783_v5 = vadd.f32 %v782_v60, %v715_v58 }
 0x1d9   :  { %v883_v6 = vpop.f32.mrf.mxu0 }
 0x1da   :  { %v891_v9 = vadd.f32 %v881_v63, %v783_v5 }
 0x1dc   :  { %v896_v15 = vadd.f32 %v1437_v10, %v891_v9 }
 0x1de   :  { %v900_v22 = vadd.f32 %v896_v15, %v241_v18 }
 0x1df   :  { %v717_v61 = vpop.f32.mrf.mxu2  ;;  %v787_v17 = vpop.f32.mrf.mxu3 }
 0x1e0   :  { %v785_v4 = vadd.f32 %v784_v1, %v717_v61  ;;  %v904_v26 = vmax.f32 %v900_v22, 0.0 }
 0x1e2   :  { %v892_v8 = vadd.f32 %v883_v6, %v785_v4 }
 0x1e4   :  { %v897_v14 = vadd.f32 %v1437_v10, %v892_v8 }
 0x1e6   :  { %v901_v21 = vadd.f32 %v897_v14, %v242_v20 }
 0x1e7   :  { %v720_v2 = vpop.f32.mrf.mxu2  ;;  %v789_v31 = vpop.f32.mrf.mxu3 }
 0x1e8   :  { %v905_v24 = vmax.f32 %v901_v21, 0.0  ;;  %v788_v25 = vadd.f32 %v787_v17, %v720_v2 }
 0x1ea   :  { %v908_v30 = vadd.f32 %v905_v24, %v904_v26 }
 0x1ec   :  { %v909_v20 = vrot.slane %v908_v30, 4 }
 0x1ee   :  { %v910_v38 = vadd.f32 %v909_v20, %v908_v30 }
 0x1ef   :  { %v722_v11 = vpop.f32.mrf.mxu2 }
 0x1f0   :  { %v790_v32 = vadd.f32 %v789_v31, %v722_v11  ;;  %v911_v40 = vrot.slane %v910_v38, 2 }
 0x1f2   :  { %v912_v43 = vadd.f32 %v911_v40, %v910_v38 }
 0x1f4   :  { %v913_v48 = vrot.slane %v912_v43, 1 }
 0x1f6   :  { %v914_v50 = vadd.f32 %v913_v48, %v912_v43 }
 0x1f7   :  { %v886_v23 = vpop.f32.mrf.mxu2 }
 0x1f8   :  { %v893_v28 = vadd.f32 %v886_v23, %v788_v25 }
 0x1fa   :  { %v898_v34 = vadd.f32 %v1437_v10, %v893_v28 }
 0x1fc   :  { %v902_v36 = vadd.f32 %v898_v34, %v243_v33 }
 0x1fe   :  { %v906_v18 = vmax.f32 %v902_v36, 0.0 }
 0x1ff   :  { %v888_v19 = vpop.f32.mrf.mxu2 }
 0x200   :  { %v894_v35 = vadd.f32 %v888_v19, %v790_v32 }
 0x202   :  { %v899_v37 = vadd.f32 %v1437_v10, %v894_v35 }
 0x204   :  { %v903_v12 = vadd.f32 %v899_v37, %v244_v52 }
 0x206   :  { %v907_v39 = vmax.f32 %v903_v12, 0.0 }
 0x208   :  { %v915_v41 = vadd.f32 %v907_v39, %v906_v18 }
 0x20a   :  { %v916_v42 = vrot.slane %v915_v41, 4 }
 0x20c   :  { %v917_v44 = vadd.f32 %v916_v42, %v915_v41 }
 0x20e   :  { %v918_v45 = vrot.slane %v917_v44, 2 }
 0x210   :  { %v919_v46 = vadd.f32 %v918_v45, %v917_v44 }
 0x212   :  { %v920_v49 = vrot.slane %v919_v46, 1 }
 0x214   :  { %v921_v51 = vadd.f32 %v920_v49, %v919_v46 }
 0x216   :  { %v922_v29 = vsel %vm247_vm5, %v914_v50, %v921_v51 }
 0x217   :  { %v923_v33 = vmul.f32 0.00390625, %v922_v29 }
 0x219   :  { %v924_v53 = vpack.c.bf16 %v923_v33, %v923_v33 }
 0x21b   :  { %1001 = vmatmul.bf16.vlgmr.msra.gmra.mxu1 %v924_v53 }
 0x298   :  { %v1002_v52 = vpop.f32.mrf.mxu1 }
 0x299   :  { %v1003_v54 = vadd.f32 %v1438_v47, %v1002_v52 }
 0x29b   :  { %1006 = vst [vmem:[%s1800_s7] sm:$0x3] %v1003_v54 }
 0x2a0   :  { %v1004_v55 = vpop.f32.mrf.mxu1 }

</bundles_post_ra>
